<compile_context>
chip_gen: v6e
topology: v6e:2x2x1
jax: 0.10.0
libtpu: 0.0.40
codegen_flags: <defaults>
</compile_context>

<pallas_src>
import math
from functools import partial

import numpy as np
import jax
import jax.numpy as jnp
from jax.experimental import pallas as pl
from jax.experimental.pallas import tpu as pltpu

NEG_INF = -1e30


# --------------------------- Kernel A: QKV + rotary ---------------------------
def qkv_rotary_kernel(x_ref, w_ref, b_ref, fr0_ref, fi0_ref, fr1_ref, fi1_ref,
                      q_att_ref, k_att_ref, v_att_ref, k_cache_ref, v_cache_ref,
                      acc_ref, *, h_chunk, d_head):
    f32 = jnp.float32
    kk = pl.program_id(3)

    @pl.when(kk == 0)
    def _init():
        acc_ref[...] = jnp.zeros_like(acc_ref)

    # bf16 x bf16 -> f32 accumulation over the contraction (K) grid axis
    acc_ref[...] += jnp.dot(x_ref[0], w_ref[...], preferred_element_type=f32)

    @pl.when(kk == pl.num_programs(3) - 1)
    def _finalize():
        e = d_head // 4
        cq = h_chunk * d_head                       # columns of one of Q/K/V part
        s_t = acc_ref.shape[0]

        fused = acc_ref[...] + b_ref[...]           # (s_t, 3*cq) f32
        q_slab = fused[:, :cq]                      # head-major, std in-head order
        k_slab = fused[:, cq:2 * cq]
        v_slab = fused[:, 2 * cq:]

        # rotary coefficient patterns (position dependent, identical per head)
        fr0 = fr0_ref[0].astype(f32)
        fi0 = fi0_ref[0].astype(f32)
        fr1 = fr1_ref[0].astype(f32)
        fi1 = fi1_ref[0].astype(f32)
        zro = jnp.zeros_like(fr0)
        cos_d = jnp.concatenate([fr0, fr0, fr1, fr1], axis=-1)        # (s_t, d)
        sin_l = jnp.concatenate([-fi0, zro, -fi1, zro], axis=-1)      # * x[j + e]
        sin_r = jnp.concatenate([zro, fi0, zro, fi1], axis=-1)        # * x[j - e]
        # broadcast across the heads of this chunk (a few d-wide lane concats)
        cos_b = jnp.concatenate([cos_d] * h_chunk, axis=-1)           # (s_t, cq)
        sin_lb = jnp.concatenate([sin_l] * h_chunk, axis=-1)
        sin_rb = jnp.concatenate([sin_r] * h_chunk, axis=-1)

        def rotate(a):
            left = jnp.concatenate([a[:, e:], a[:, :e]], axis=-1)     # a[j + e]
            right = jnp.concatenate([a[:, -e:], a[:, :-e]], axis=-1)  # a[j - e]
            return a * cos_b + left * sin_lb + right * sin_rb

        q_rot = rotate(q_slab)                      # Q weights were pre-scaled
        k_rot = rotate(k_slab)

        for h in range(h_chunk):
            cols = slice(h * d_head, (h + 1) * d_head)
            q_att_ref[0, h] = q_rot[:, cols].astype(q_att_ref.dtype)
            k_att_ref[0, h] = k_rot[:, cols].astype(k_att_ref.dtype)
            v_att_ref[0, h] = v_slab[:, cols].astype(v_att_ref.dtype)
            k_cache_ref[0, :, h, :] = k_rot[:, cols].astype(k_cache_ref.dtype)
            v_cache_ref[0, :, h, :] = v_slab[:, cols].astype(v_cache_ref.dtype)


# --------------------------- Kernel B: flash attention -------------------------
def flash_attention_kernel(q_ref, k_ref, v_ref, out_ref, m_sc, l_sc, acc_sc,
                           *, causal):
    f32 = jnp.float32
    qi = pl.program_id(2)
    ki = pl.program_id(3)
    h_blk = q_ref.shape[1]
    sq_t = q_ref.shape[2]
    sk_t = k_ref.shape[2]

    @pl.when(ki == 0)
    def _init():
        m_sc[...] = jnp.full_like(m_sc, NEG_INF)
        l_sc[...] = jnp.zeros_like(l_sc)
        acc_sc[...] = jnp.zeros_like(acc_sc)

    q_start = qi * sq_t
    k_start = ki * sk_t

    def _compute():
        q = q_ref[0]                               # (h, Sq, d) bf16, pre-scaled
        k = k_ref[0]                               # (h, Sk, d) bf16
        v = v_ref[0]                               # (h, Sk, d) bf16
        s = jax.lax.dot_general(q, k, (((2,), (2,)), ((0,), (0,))),
                                preferred_element_type=f32)      # (h, Sq, Sk)
        if causal:
            row = q_start + jax.lax.broadcasted_iota(jnp.int32, s.shape, 1)
            col = k_start + jax.lax.broadcasted_iota(jnp.int32, s.shape, 2)
            s = jnp.where(row >= col, s, NEG_INF)

        m_prev = m_sc[...]                                       # (h, Sq)
        m_new = jnp.maximum(m_prev, jnp.max(s, axis=-1))
        alpha = jnp.exp(m_prev - m_new)
        # guard rows that are fully masked so far (running max still NEG_INF)
        m_safe = jnp.where(m_new > NEG_INF * 0.5, m_new, 0.0)
        p = jnp.exp(s - m_safe[:, :, None])                      # (h, Sq, Sk)
        l_sc[...] = alpha * l_sc[...] + jnp.sum(p, axis=-1)
        pv = jax.lax.dot_general(p.astype(v.dtype), v,
                                 (((2,), (1,)), ((0,), (0,))),
                                 preferred_element_type=f32)     # (h, Sq, d)
        acc_sc[...] = alpha[:, :, None] * acc_sc[...] + pv
        m_sc[...] = m_new

    if causal:
        # skip key tiles that are entirely in the future of this query tile
        pl.when(k_start <= q_start + sq_t - 1)(_compute)
    else:
        _compute()

    @pl.when(ki == pl.num_programs(3) - 1)
    def _finalize():
        l = l_sc[...]
        inv_l = pl.reciprocal(jnp.where(l > 0.0, l, 1.0), approx=True)  # (h, Sq)
        ctx = acc_sc[...] * inv_l[:, :, None]                           # (h,Sq,d)
        for h in range(h_blk):
            out_ref[0, :, h, :] = ctx[h].astype(out_ref.dtype)


# --------------------------- Kernel C: output projection -----------------------
def o_proj_kernel(x_ref, w_ref, b_ref, out_ref, acc_ref):
    kk = pl.program_id(3)

    @pl.when(kk == 0)
    def _init():
        acc_ref[...] = jnp.zeros_like(acc_ref)

    acc_ref[...] += jnp.dot(x_ref[0], w_ref[...],
                            preferred_element_type=jnp.float32)

    @pl.when(kk == pl.num_programs(3) - 1)
    def _finalize():
        out_ref[0] = (acc_ref[...] + b_ref[...]).astype(out_ref.dtype)


# --------------------------------- helpers -------------------------------------
def _fit_tile(dim, desired, multiple):
    t = min(desired, dim)
    for cand in range(t, 0, -1):
        if dim % cand == 0 and (cand % multiple == 0 or cand == dim):
            return cand
    return dim


def _pick_head_chunk(n_head, desired):
    c = min(desired, n_head)
    for cand in range(c, 0, -1):
        if n_head % cand == 0 and (cand % 8 == 0 or cand == n_head):
            return cand
    return n_head


def _default_vmem_limit():
    # ~48 MiB on v7x (64 MiB physical), ~96 MiB on v5e/v6e (128 MiB physical)
    try:
        cap = pltpu.get_tpu_info().vmem_capacity_bytes
        return int(min(cap * 3 // 4, 100 * 1024 * 1024))
    except Exception:
        return 64 * 1024 * 1024


# --------------------------------- wrapper --------------------------------------
def glm_attention_pallas(x, w_qkv, b_qkv, w_o, b_o, freqs_cis, *,
                         n_head, layer_idx, causal=True,
                         proj_seq_tile=256, proj_k_tile=512, proj_head_chunk=8,
                         attn_q_tile=256, attn_k_tile=256, attn_head_chunk=8,
                         oproj_seq_tile=256, oproj_n_tile=1024, oproj_k_tile=512,
                         vmem_limit_bytes=None):
    """GLMAttention forward (pe_2d=True, use_past=False, dropout=0, causal mask).

    Returns (output, (k_cache, v_cache)) matching the PyTorch module.
    `layer_idx` is accepted for API parity: the (layer_idx+1) scaling coeff
    cancels exactly when the softmax runs in f32.
    """
    del layer_idx  # cancels in f32 softmax
    B, S, N = x.shape
    H = n_head
    d = N // H
    e = d // 4
    assert N % (H * 4) == 0

    if vmem_limit_bytes is None:
        vmem_limit_bytes = _default_vmem_limit()

    # ---- glue: one-time weight packing (chunk-major [Q|K|V] per head-chunk) ----
    # Fold 1/sqrt(d_head) into the Q rows (rotary is linear, so exact).
    inv_scale = 1.0 / math.sqrt(d)
    out_idx = np.arange(3 * N)
    q_row = ((out_idx // d) % 3) == 0
    scale_vec = jnp.asarray(np.where(q_row, inv_scale, 1.0).astype(np.float32))

    hc = _pick_head_chunk(H, proj_head_chunk)
    j = np.arange(d)
    perm_parts = []
    for c in range(H // hc):
        heads = np.arange(c * hc, (c + 1) * hc)
        for part in range(3):                      # 0=Q, 1=K, 2=V
            perm_parts.append(
                ((heads[:, None] * 3 + part) * d + j[None, :]).reshape(-1))
    perm = np.concatenate(perm_parts)

    w_scaled = jnp.asarray(w_qkv) * scale_vec[:, None]
    b_scaled = jnp.asarray(b_qkv) * scale_vec
    w_packed = w_scaled[perm].T.astype(jnp.bfloat16)            # (N, 3N)
    b_packed = b_scaled[perm].reshape(1, 3 * N).astype(jnp.float32)
    w_o_t = jnp.asarray(w_o).T.astype(jnp.bfloat16)             # (N, N)
    b_o2 = jnp.asarray(b_o).reshape(1, N).astype(jnp.float32)

    (fr0, fi0), (fr1, fi1) = freqs_cis                          # each (B, S, e)
    x_bf = x.astype(jnp.bfloat16)

    # ---------------- Kernel A: fused QKV projection + rotary -------------------
    s_tile = _fit_tile(S, proj_seq_tile, 8)
    kp_tile = _fit_tile(N, proj_k_tile, 128)
    cols = 3 * hc * d

    proj_kernel = partial(qkv_rotary_kernel, h_chunk=hc, d_head=d)
    q_att, k_att, v_att, k_cache, v_cache = pl.pallas_call(
        proj_kernel,
        out_shape=(
            jax.ShapeDtypeStruct((B, H, S, d), jnp.bfloat16),    # Q (attention)
            jax.ShapeDtypeStruct((B, H, S, d), jnp.bfloat16),    # K (attention)
            jax.ShapeDtypeStruct((B, H, S, d), jnp.bfloat16),    # V (attention)
            jax.ShapeDtypeStruct((B, S, H, d), x.dtype),         # kv_cache K
            jax.ShapeDtypeStruct((B, S, H, d), x.dtype),         # kv_cache V
        ),
        grid_spec=pltpu.PrefetchScalarGridSpec(
            num_scalar_prefetch=0,
            grid=(B, S // s_tile, H // hc, N // kp_tile),
            in_specs=[
                pl.BlockSpec((1, s_tile, kp_tile), lambda b, s, c, k: (b, s, k)),
                pl.BlockSpec((kp_tile, cols), lambda b, s, c, k: (k, c)),
                pl.BlockSpec((1, cols), lambda b, s, c, k: (0, c)),
                pl.BlockSpec((1, s_tile, e), lambda b, s, c, k: (b, s, 0)),
                pl.BlockSpec((1, s_tile, e), lambda b, s, c, k: (b, s, 0)),
                pl.BlockSpec((1, s_tile, e), lambda b, s, c, k: (b, s, 0)),
                pl.BlockSpec((1, s_tile, e), lambda b, s, c, k: (b, s, 0)),
            ],
            out_specs=[
                pl.BlockSpec((1, hc, s_tile, d), lambda b, s, c, k: (b, c, s, 0)),
                pl.BlockSpec((1, hc, s_tile, d), lambda b, s, c, k: (b, c, s, 0)),
                pl.BlockSpec((1, hc, s_tile, d), lambda b, s, c, k: (b, c, s, 0)),
                pl.BlockSpec((1, s_tile, hc, d), lambda b, s, c, k: (b, s, c, 0)),
                pl.BlockSpec((1, s_tile, hc, d), lambda b, s, c, k: (b, s, c, 0)),
            ],
            scratch_shapes=[pltpu.VMEM((s_tile, cols), jnp.float32)],
        ),
        compiler_params=pltpu.CompilerParams(
            dimension_semantics=("parallel", "parallel", "parallel", "arbitrary"),
            vmem_limit_bytes=vmem_limit_bytes),
    )(x_bf, w_packed, b_packed, fr0, fi0, fr1, fi1)

    # ---------------- Kernel B: flash attention ---------------------------------
    sq_t = _fit_tile(S, attn_q_tile, 8)
    sk_t = _fit_tile(S, attn_k_tile, 8)
    hb = _pick_head_chunk(H, attn_head_chunk)

    if causal:
        def kv_index_map(b, h, qi, ki):
            last = (qi * sq_t + sq_t - 1) // sk_t
            return (b, h, jnp.minimum(ki, last), 0)
    else:
        def kv_index_map(b, h, qi, ki):
            return (b, h, ki, 0)

    attn_kernel = partial(flash_attention_kernel, causal=causal)
    ctx = pl.pallas_call(
        attn_kernel,
        out_shape=jax.ShapeDtypeStruct((B, S, H, d), jnp.bfloat16),
        grid_spec=pltpu.PrefetchScalarGridSpec(
            num_scalar_prefetch=0,
            grid=(B, H // hb, S // sq_t, S // sk_t),
            in_specs=[
                pl.BlockSpec((1, hb, sq_t, d), lambda b, h, qi, ki: (b, h, qi, 0)),
                pl.BlockSpec((1, hb, sk_t, d), kv_index_map),
                pl.BlockSpec((1, hb, sk_t, d), kv_index_map),
            ],
            out_specs=pl.BlockSpec((1, sq_t, hb, d),
                                   lambda b, h, qi, ki: (b, qi, h, 0)),
            scratch_shapes=[
                pltpu.VMEM((hb, sq_t), jnp.float32),      # running max
                pltpu.VMEM((hb, sq_t), jnp.float32),      # running denominator
                pltpu.VMEM((hb, sq_t, d), jnp.float32),   # output accumulator
            ],
        ),
        compiler_params=pltpu.CompilerParams(
            dimension_semantics=("parallel", "parallel", "parallel", "arbitrary"),
            vmem_limit_bytes=vmem_limit_bytes),
    )(q_att, k_att, v_att)

    # ---------------- Kernel C: output projection GEMM --------------------------
    ctx_2d = ctx.reshape(B, S, N)                   # free reshape (head-major)
    so_t = _fit_tile(S, oproj_seq_tile, 8)
    no_t = _fit_tile(N, oproj_n_tile, 128)
    ko_t = _fit_tile(N, oproj_k_tile, 128)

    out = pl.pallas_call(
        o_proj_kernel,
        out_shape=jax.ShapeDtypeStruct((B, S, N), x.dtype),
        grid_spec=pltpu.PrefetchScalarGridSpec(
            num_scalar_prefetch=0,
            grid=(B, S // so_t, N // no_t, N // ko_t),
            in_specs=[
                pl.BlockSpec((1, so_t, ko_t), lambda b, s, n, k: (b, s, k)),
                pl.BlockSpec((ko_t, no_t), lambda b, s, n, k: (k, n)),
                pl.BlockSpec((1, no_t), lambda b, s, n, k: (0, n)),
            ],
            out_specs=pl.BlockSpec((1, so_t, no_t), lambda b, s, n, k: (b, s, n)),
            scratch_shapes=[pltpu.VMEM((so_t, no_t), jnp.float32)],
        ),
        compiler_params=pltpu.CompilerParams(
            dimension_semantics=("parallel", "parallel", "parallel", "arbitrary"),
            vmem_limit_bytes=vmem_limit_bytes),
    )(ctx_2d, w_o_t, b_o2)

    return out, (k_cache, v_cache)


# ------------------------- pure-JAX reference (module spec) ---------------------
def _apply_rotary_emb_ref(x_r, x_i, fr, fi):
    fr = fr[:, :, None, :]
    fi = fi[:, :, None, :]
    o_r = x_r * fr - x_i * fi
    o_i = x_r * fi + x_i * fr
    return jnp.concatenate([o_r, o_i], axis=-1)


def glm_attention_ref(x, w_qkv, b_qkv, w_o, b_o, freqs_cis, mask,
                      *, n_head, layer_idx):
    B, S, N = x.shape
    d = N // n_head
    e = d // 4
    fused = (x @ w_qkv.T + b_qkv).reshape(B, S, n_head, 3 * d)
    q, k, v = fused[..., :d], fused[..., d:2 * d], fused[..., 2 * d:]
    q1_r, q1_i, q2_r, q2_i = (q[..., i * e:(i + 1) * e] for i in range(4))
    k1_r, k1_i, k2_r, k2_i = (k[..., i * e:(i + 1) * e] for i in range(4))
    (fr0, fi0), (fr1, fi1) = freqs_cis
    q1 = _apply_rotary_emb_ref(q1_r, q1_i, fr0, fi0)
    q2 = _apply_rotary_emb_ref(q2_r, q2_i, fr1, fi1)
    k1 = _apply_rotary_emb_ref(k1_r, k1_i, fr0, fi0)
    k2 = _apply_rotary_emb_ref(k2_r, k2_i, fr1, fi1)
    q = jnp.concatenate([q1, q2], axis=-1)
    k = jnp.concatenate([k1, k2], axis=-1)
    kv_cache = (k, v)                       # merge_kv_cache with use_past=False
    qt = q.transpose(0, 2, 1, 3)
    kt = k.transpose(0, 2, 3, 1)
    vt = v.transpose(0, 2, 1, 3)
    coeff = float(layer_idx + 1)
    qt = qt / (math.sqrt(d) * coeff)
    qk = jnp.matmul(qt, kt) + mask[:, None, :, :]
    scores = jax.nn.softmax(qk.astype(jnp.float32) * coeff, axis=-1).astype(x.dtype)
    out = jnp.matmul(scores, vt).transpose(0, 2, 1, 3).reshape(B, S, N)
    out = out @ w_o.T + b_o
    return out, kv_cache


if __name__ == "__main__":
    # small shapes consistent with the module: n_state % (n_head*4) == 0
    B, S, n_head, d_head = 2, 8, 4, 8
    N = n_head * d_head                    # n_state = 32
    e = d_head // 4
    layer_idx = 3

    key = jax.random.PRNGKey(0)
    ks = jax.random.split(key, 7)
    x = jax.random.normal(ks[0], (B, S, N), jnp.float32)
    w_qkv = jax.random.normal(ks[1], (3 * N, N), jnp.float32) * 0.1
    b_qkv = jax.random.normal(ks[2], (3 * N,), jnp.float32) * 0.1
    w_o = jax.random.normal(ks[3], (N, N), jnp.float32) * 0.1
    b_o = jax.random.normal(ks[4], (N,), jnp.float32) * 0.1
    theta0 = jax.random.uniform(ks[5], (B, S, e), jnp.float32, 0.0, 2 * math.pi)
    theta1 = jax.random.uniform(ks[6], (B, S, e), jnp.float32, 0.0, 2 * math.pi)
    freqs_cis = ((jnp.cos(theta0), jnp.sin(theta0)),
                 (jnp.cos(theta1), jnp.sin(theta1)))

    # TODO(synk): dropout (rate=0.0 -> identity), use_past=True KV concat, and
    # arbitrary (non-causal) attention_mask tensors are not exercised; the
    # causal mask is generated in-kernel.

    out, (k_cache, v_cache) = glm_attention_pallas(
        x, w_qkv, b_qkv, w_o, b_o, freqs_cis,
        n_head=n_head, layer_idx=layer_idx, causal=True)
    jax.block_until_ready(out)
    jax.block_until_ready(k_cache)
    jax.block_until_ready(v_cache)

    causal_mask = jnp.broadcast_to(
        jnp.triu(jnp.full((S, S), -1e9, jnp.float32), k=1), (B, S, S))
    out_ref, (k_ref, v_ref) = glm_attention_ref(
        x, w_qkv, b_qkv, w_o, b_o, freqs_cis, causal_mask,
        n_head=n_head, layer_idx=layer_idx)

    # bf16 matmul operands -> compare against the f32 reference with bf16-level
    # tolerances (softmax statistics and accumulation stay in f32).
    np.testing.assert_allclose(np.asarray(out), np.asarray(out_ref),
                               rtol=3e-2, atol=3e-2)
    np.testing.assert_allclose(np.asarray(k_cache), np.asarray(k_ref),
                               rtol=2e-2, atol=2e-2)
    np.testing.assert_allclose(np.asarray(v_cache), np.asarray(v_ref),
                               rtol=2e-2, atol=2e-2)
    print("KERNEL_OK")
</pallas_src>

<mosaic_0001>
module attributes {stable_mosaic.version = 11 : i64} {
  func.func @qkv_rotary_kernel(%arg0: i32, %arg1: i32, %arg2: i32, %arg3: i32, %arg4: memref<1x8x32xbf16, #tpu.memory_space<vmem>>, %arg5: memref<32x96xbf16, #tpu.memory_space<vmem>>, %arg6: memref<1x96xf32, #tpu.memory_space<vmem>>, %arg7: memref<1x8x2xf32, #tpu.memory_space<vmem>>, %arg8: memref<1x8x2xf32, #tpu.memory_space<vmem>>, %arg9: memref<1x8x2xf32, #tpu.memory_space<vmem>>, %arg10: memref<1x8x2xf32, #tpu.memory_space<vmem>>, %arg11: memref<1x4x8x8xbf16, #tpu.memory_space<vmem>>, %arg12: memref<1x4x8x8xbf16, #tpu.memory_space<vmem>>, %arg13: memref<1x4x8x8xbf16, #tpu.memory_space<vmem>>, %arg14: memref<1x8x4x8xf32, #tpu.memory_space<vmem>>, %arg15: memref<1x8x4x8xf32, #tpu.memory_space<vmem>>, %arg16: memref<8x96xf32, #tpu.memory_space<vmem>>) attributes {dimension_semantics = [#tpu.dimension_semantics<parallel>, #tpu.dimension_semantics<parallel>, #tpu.dimension_semantics<parallel>, #tpu.dimension_semantics<arbitrary>], iteration_bounds = array<i64: 2, 1, 1, 1>, scalar_prefetch = 0 : i64, scratch_operands = 1 : i64, tpu.core_type = #tpu.core_type<tc>, window_params = [{transform_indices = @transform_0, window_bounds = array<i64: 1, 8, 32>}, {transform_indices = @transform_1, window_bounds = array<i64: 32, 96>}, {transform_indices = @transform_2, window_bounds = array<i64: 1, 96>}, {transform_indices = @transform_3, window_bounds = array<i64: 1, 8, 2>}, {transform_indices = @transform_4, window_bounds = array<i64: 1, 8, 2>}, {transform_indices = @transform_5, window_bounds = array<i64: 1, 8, 2>}, {transform_indices = @transform_6, window_bounds = array<i64: 1, 8, 2>}, {transform_indices = @transform_7, window_bounds = array<i64: 1, 4, 8, 8>}, {transform_indices = @transform_8, window_bounds = array<i64: 1, 4, 8, 8>}, {transform_indices = @transform_9, window_bounds = array<i64: 1, 4, 8, 8>}, {transform_indices = @transform_10, window_bounds = array<i64: 1, 8, 4, 8>}, {transform_indices = @transform_11, window_bounds = array<i64: 1, 8, 4, 8>}]} {
    %c0_i32 = arith.constant 0 : i32
    %0 = arith.cmpi eq, %arg3, %c0_i32 : i32
    %1 = arith.extui %0 : i1 to i32
    %c0_i32_0 = arith.constant 0 : i32
    %2 = arith.cmpi ne, %1, %c0_i32_0 : i32
    scf.if %2 {
      %cst_11 = arith.constant 0.000000e+00 : f32
      %13 = vector.broadcast %cst_11 : f32 to vector<8x96xf32>
      %c0_12 = arith.constant 0 : index
      %c0_13 = arith.constant 0 : index
      %14 = vector.load %arg16[%c0_12, %c0_13] : memref<8x96xf32, #tpu.memory_space<vmem>>, vector<8x96xf32>
      tpu.vector_store %arg16[%c0_12, %c0_13], %13 {strides = array<i32>} : memref<8x96xf32, #tpu.memory_space<vmem>>, vector<8x96xf32>,
    } else {
    }
    %c0 = arith.constant 0 : index
    %c0_1 = arith.constant 0 : index
    %3 = vector.load %arg16[%c0, %c0_1] : memref<8x96xf32, #tpu.memory_space<vmem>>, vector<8x96xf32>
    %c0_2 = arith.constant 0 : index
    %c0_3 = arith.constant 0 : index
    %c0_4 = arith.constant 0 : index
    %4 = vector.load %arg4[%c0_2, %c0_3, %c0_4] : memref<1x8x32xbf16, #tpu.memory_space<vmem>>, vector<1x8x32xbf16>
    %5 = vector.shape_cast %4 : vector<1x8x32xbf16> to vector<8x32xbf16>
    %c0_5 = arith.constant 0 : index
    %c0_6 = arith.constant 0 : index
    %6 = vector.load %arg5[%c0_5, %c0_6] : memref<32x96xbf16, #tpu.memory_space<vmem>>, vector<32x96xbf16>
    %cst = arith.constant dense<0.000000e+00> : vector<8x96xf32>
    %7 = tpu.matmul %5, %6, %cst {dimension_numbers = #tpu.dot_dimension_numbers<[1], [0], [0], [1], [0, 0, 1, 1], [], []>} : vector<8x32xbf16>, vector<32x96xbf16>, vector<8x96xf32> -> vector<8x96xf32>
    %8 = arith.addf %3, %7 : vector<8x96xf32>
    %c0_7 = arith.constant 0 : index
    %c0_8 = arith.constant 0 : index
    %9 = vector.load %arg16[%c0_7, %c0_8] : memref<8x96xf32, #tpu.memory_space<vmem>>, vector<8x96xf32>
    tpu.vector_store %arg16[%c0_7, %c0_8], %8 {strides = array<i32>} : memref<8x96xf32, #tpu.memory_space<vmem>>, vector<8x96xf32>,
    %c0_i32_9 = arith.constant 0 : i32
    %10 = arith.cmpi eq, %arg3, %c0_i32_9 : i32
    %11 = arith.extui %10 : i1 to i32
    %c0_i32_10 = arith.constant 0 : i32
    %12 = arith.cmpi ne, %11, %c0_i32_10 : i32
    scf.if %12 {
      %c0_11 = arith.constant 0 : index
      %c0_12 = arith.constant 0 : index
      %13 = vector.load %arg16[%c0_11, %c0_12] : memref<8x96xf32, #tpu.memory_space<vmem>>, vector<8x96xf32>
      %c0_13 = arith.constant 0 : index
      %c0_14 = arith.constant 0 : index
      %14 = vector.load %arg6[%c0_13, %c0_14] : memref<1x96xf32, #tpu.memory_space<vmem>>, vector<1x96xf32>
      %15 = vector.broadcast %14 : vector<1x96xf32> to vector<8x96xf32>
      %16 = arith.addf %13, %15 : vector<8x96xf32>
      %17 = vector.extract_strided_slice %16 {offsets = [0, 0], sizes = [8, 32], strides = [1, 1]} : vector<8x96xf32> to vector<8x32xf32>
      %18 = vector.extract_strided_slice %16 {offsets = [0, 32], sizes = [8, 32], strides = [1, 1]} : vector<8x96xf32> to vector<8x32xf32>
      %19 = vector.extract_strided_slice %16 {offsets = [0, 64], sizes = [8, 32], strides = [1, 1]} : vector<8x96xf32> to vector<8x32xf32>
      %c0_15 = arith.constant 0 : index
      %c0_16 = arith.constant 0 : index
      %c0_17 = arith.constant 0 : index
      %20 = vector.load %arg7[%c0_15, %c0_16, %c0_17] : memref<1x8x2xf32, #tpu.memory_space<vmem>>, vector<1x8x2xf32>
      %21 = vector.shape_cast %20 : vector<1x8x2xf32> to vector<8x2xf32>
      %c0_18 = arith.constant 0 : index
      %c0_19 = arith.constant 0 : index
      %c0_20 = arith.constant 0 : index
      %22 = vector.load %arg8[%c0_18, %c0_19, %c0_20] : memref<1x8x2xf32, #tpu.memory_space<vmem>>, vector<1x8x2xf32>
      %23 = vector.shape_cast %22 : vector<1x8x2xf32> to vector<8x2xf32>
      %c0_21 = arith.constant 0 : index
      %c0_22 = arith.constant 0 : index
      %c0_23 = arith.constant 0 : index
      %24 = vector.load %arg9[%c0_21, %c0_22, %c0_23] : memref<1x8x2xf32, #tpu.memory_space<vmem>>, vector<1x8x2xf32>
      %25 = vector.shape_cast %24 : vector<1x8x2xf32> to vector<8x2xf32>
      %c0_24 = arith.constant 0 : index
      %c0_25 = arith.constant 0 : index
      %c0_26 = arith.constant 0 : index
      %26 = vector.load %arg10[%c0_24, %c0_25, %c0_26] : memref<1x8x2xf32, #tpu.memory_space<vmem>>, vector<1x8x2xf32>
      %27 = vector.shape_cast %26 : vector<1x8x2xf32> to vector<8x2xf32>
      %cst_27 = arith.constant 0.000000e+00 : f32
      %28 = vector.broadcast %cst_27 : f32 to vector<8x2xf32>
      %29 = tpu.concatenate %21, %21, %25, %25 in 1 : vector<8x2xf32>, vector<8x2xf32>, vector<8x2xf32>, vector<8x2xf32> -> vector<8x8xf32>
      %cst_28 = arith.constant 0.000000e+00 : f32
      %30 = vector.broadcast %cst_28 : f32 to vector<8x2xf32>
      %31 = arith.subf %30, %23 : vector<8x2xf32>
      %cst_29 = arith.constant 0.000000e+00 : f32
      %32 = vector.broadcast %cst_29 : f32 to vector<8x2xf32>
      %33 = arith.subf %32, %27 : vector<8x2xf32>
      %34 = tpu.concatenate %31, %28, %33, %28 in 1 : vector<8x2xf32>, vector<8x2xf32>, vector<8x2xf32>, vector<8x2xf32> -> vector<8x8xf32>
      %35 = tpu.concatenate %28, %23, %28, %27 in 1 : vector<8x2xf32>, vector<8x2xf32>, vector<8x2xf32>, vector<8x2xf32> -> vector<8x8xf32>
      %36 = tpu.concatenate %29, %29, %29, %29 in 1 : vector<8x8xf32>, vector<8x8xf32>, vector<8x8xf32>, vector<8x8xf32> -> vector<8x32xf32>
      %37 = tpu.concatenate %34, %34, %34, %34 in 1 : vector<8x8xf32>, vector<8x8xf32>, vector<8x8xf32>, vector<8x8xf32> -> vector<8x32xf32>
      %38 = tpu.concatenate %35, %35, %35, %35 in 1 : vector<8x8xf32>, vector<8x8xf32>, vector<8x8xf32>, vector<8x8xf32> -> vector<8x32xf32>
      %39 = vector.extract_strided_slice %17 {offsets = [0, 2], sizes = [8, 30], strides = [1, 1]} : vector<8x32xf32> to vector<8x30xf32>
      %40 = vector.extract_strided_slice %17 {offsets = [0, 0], sizes = [8, 2], strides = [1, 1]} : vector<8x32xf32> to vector<8x2xf32>
      %41 = tpu.concatenate %39, %40 in 1 : vector<8x30xf32>, vector<8x2xf32> -> vector<8x32xf32>
      %42 = vector.extract_strided_slice %17 {offsets = [0, 30], sizes = [8, 2], strides = [1, 1]} : vector<8x32xf32> to vector<8x2xf32>
      %43 = vector.extract_strided_slice %17 {offsets = [0, 0], sizes = [8, 30], strides = [1, 1]} : vector<8x32xf32> to vector<8x30xf32>
      %44 = tpu.concatenate %42, %43 in 1 : vector<8x2xf32>, vector<8x30xf32> -> vector<8x32xf32>
      %45 = arith.mulf %17, %36 : vector<8x32xf32>
      %46 = arith.mulf %41, %37 : vector<8x32xf32>
      %47 = arith.addf %45, %46 : vector<8x32xf32>
      %48 = arith.mulf %44, %38 : vector<8x32xf32>
      %49 = arith.addf %47, %48 : vector<8x32xf32>
      %50 = vector.extract_strided_slice %18 {offsets = [0, 2], sizes = [8, 30], strides = [1, 1]} : vector<8x32xf32> to vector<8x30xf32>
      %51 = vector.extract_strided_slice %18 {offsets = [0, 0], sizes = [8, 2], strides = [1, 1]} : vector<8x32xf32> to vector<8x2xf32>
      %52 = tpu.concatenate %50, %51 in 1 : vector<8x30xf32>, vector<8x2xf32> -> vector<8x32xf32>
      %53 = vector.extract_strided_slice %18 {offsets = [0, 30], sizes = [8, 2], strides = [1, 1]} : vector<8x32xf32> to vector<8x2xf32>
      %54 = vector.extract_strided_slice %18 {offsets = [0, 0], sizes = [8, 30], strides = [1, 1]} : vector<8x32xf32> to vector<8x30xf32>
      %55 = tpu.concatenate %53, %54 in 1 : vector<8x2xf32>, vector<8x30xf32> -> vector<8x32xf32>
      %56 = arith.mulf %18, %36 : vector<8x32xf32>
      %57 = arith.mulf %52, %37 : vector<8x32xf32>
      %58 = arith.addf %56, %57 : vector<8x32xf32>
      %59 = arith.mulf %55, %38 : vector<8x32xf32>
      %60 = arith.addf %58, %59 : vector<8x32xf32>
      %61 = vector.extract_strided_slice %49 {offsets = [0, 0], sizes = [8, 8], strides = [1, 1]} : vector<8x32xf32> to vector<8x8xf32>
      %62 = arith.truncf %61 : vector<8x8xf32> to vector<8x8xbf16>
      %c0_30 = arith.constant 0 : index
      %c0_31 = arith.constant 0 : index
      %c0_32 = arith.constant 0 : index
      %c0_33 = arith.constant 0 : index
      %63 = vector.load %arg11[%c0_30, %c0_31, %c0_32, %c0_33] : memref<1x4x8x8xbf16, #tpu.memory_space<vmem>>, vector<1x1x8x8xbf16>
      %64 = vector.shape_cast %63 : vector<1x1x8x8xbf16> to vector<8x8xbf16>
      %65 = vector.shape_cast %62 : vector<8x8xbf16> to vector<1x1x8x8xbf16>
      tpu.vector_store %arg11[%c0_30, %c0_31, %c0_32, %c0_33], %65 {strides = array<i32>} : memref<1x4x8x8xbf16, #tpu.memory_space<vmem>>, vector<1x1x8x8xbf16>,
      %66 = vector.extract_strided_slice %60 {offsets = [0, 0], sizes = [8, 8], strides = [1, 1]} : vector<8x32xf32> to vector<8x8xf32>
      %67 = arith.truncf %66 : vector<8x8xf32> to vector<8x8xbf16>
      %c0_34 = arith.constant 0 : index
      %c0_35 = arith.constant 0 : index
      %c0_36 = arith.constant 0 : index
      %c0_37 = arith.constant 0 : index
      %68 = vector.load %arg12[%c0_34, %c0_35, %c0_36, %c0_37] : memref<1x4x8x8xbf16, #tpu.memory_space<vmem>>, vector<1x1x8x8xbf16>
      %69 = vector.shape_cast %68 : vector<1x1x8x8xbf16> to vector<8x8xbf16>
      %70 = vector.shape_cast %67 : vector<8x8xbf16> to vector<1x1x8x8xbf16>
      tpu.vector_store %arg12[%c0_34, %c0_35, %c0_36, %c0_37], %70 {strides = array<i32>} : memref<1x4x8x8xbf16, #tpu.memory_space<vmem>>, vector<1x1x8x8xbf16>,
      %71 = vector.extract_strided_slice %19 {offsets = [0, 0], sizes = [8, 8], strides = [1, 1]} : vector<8x32xf32> to vector<8x8xf32>
      %72 = arith.truncf %71 : vector<8x8xf32> to vector<8x8xbf16>
      %c0_38 = arith.constant 0 : index
      %c0_39 = arith.constant 0 : index
      %c0_40 = arith.constant 0 : index
      %c0_41 = arith.constant 0 : index
      %73 = vector.load %arg13[%c0_38, %c0_39, %c0_40, %c0_41] : memref<1x4x8x8xbf16, #tpu.memory_space<vmem>>, vector<1x1x8x8xbf16>
      %74 = vector.shape_cast %73 : vector<1x1x8x8xbf16> to vector<8x8xbf16>
      %75 = vector.shape_cast %72 : vector<8x8xbf16> to vector<1x1x8x8xbf16>
      tpu.vector_store %arg13[%c0_38, %c0_39, %c0_40, %c0_41], %75 {strides = array<i32>} : memref<1x4x8x8xbf16, #tpu.memory_space<vmem>>, vector<1x1x8x8xbf16>,
      %76 = vector.extract_strided_slice %60 {offsets = [0, 0], sizes = [8, 8], strides = [1, 1]} : vector<8x32xf32> to vector<8x8xf32>
      %c0_42 = arith.constant 0 : index
      %c0_43 = arith.constant 0 : index
      %c0_44 = arith.constant 0 : index
      %c0_45 = arith.constant 0 : index
      %77 = vector.load %arg14[%c0_42, %c0_43, %c0_44, %c0_45] : memref<1x8x4x8xf32, #tpu.memory_space<vmem>>, vector<1x8x1x8xf32>
      %78 = vector.shape_cast %77 : vector<1x8x1x8xf32> to vector<8x8xf32>
      %79 = vector.shape_cast %76 : vector<8x8xf32> to vector<1x8x1x8xf32>
      tpu.vector_store %arg14[%c0_42, %c0_43, %c0_44, %c0_45], %79 {strides = array<i32>} : memref<1x8x4x8xf32, #tpu.memory_space<vmem>>, vector<1x8x1x8xf32>,
      %80 = vector.extract_strided_slice %19 {offsets = [0, 0], sizes = [8, 8], strides = [1, 1]} : vector<8x32xf32> to vector<8x8xf32>
      %c0_46 = arith.constant 0 : index
      %c0_47 = arith.constant 0 : index
      %c0_48 = arith.constant 0 : index
      %c0_49 = arith.constant 0 : index
      %81 = vector.load %arg15[%c0_46, %c0_47, %c0_48, %c0_49] : memref<1x8x4x8xf32, #tpu.memory_space<vmem>>, vector<1x8x1x8xf32>
      %82 = vector.shape_cast %81 : vector<1x8x1x8xf32> to vector<8x8xf32>
      %83 = vector.shape_cast %80 : vector<8x8xf32> to vector<1x8x1x8xf32>
      tpu.vector_store %arg15[%c0_46, %c0_47, %c0_48, %c0_49], %83 {strides = array<i32>} : memref<1x8x4x8xf32, #tpu.memory_space<vmem>>, vector<1x8x1x8xf32>,
      %84 = vector.extract_strided_slice %49 {offsets = [0, 8], sizes = [8, 8], strides = [1, 1]} : vector<8x32xf32> to vector<8x8xf32>
      %85 = arith.truncf %84 : vector<8x8xf32> to vector<8x8xbf16>
      %c0_50 = arith.constant 0 : index
      %c1 = arith.constant 1 : index
      %c0_51 = arith.constant 0 : index
      %c0_52 = arith.constant 0 : index
      %86 = vector.load %arg11[%c0_50, %c1, %c0_51, %c0_52] : memref<1x4x8x8xbf16, #tpu.memory_space<vmem>>, vector<1x1x8x8xbf16>
      %87 = vector.shape_cast %86 : vector<1x1x8x8xbf16> to vector<8x8xbf16>
      %88 = vector.shape_cast %85 : vector<8x8xbf16> to vector<1x1x8x8xbf16>
      tpu.vector_store %arg11[%c0_50, %c1, %c0_51, %c0_52], %88 {strides = array<i32>} : memref<1x4x8x8xbf16, #tpu.memory_space<vmem>>, vector<1x1x8x8xbf16>,
      %89 = vector.extract_strided_slice %60 {offsets = [0, 8], sizes = [8, 8], strides = [1, 1]} : vector<8x32xf32> to vector<8x8xf32>
      %90 = arith.truncf %89 : vector<8x8xf32> to vector<8x8xbf16>
      %c0_53 = arith.constant 0 : index
      %c1_54 = arith.constant 1 : index
      %c0_55 = arith.constant 0 : index
      %c0_56 = arith.constant 0 : index
      %91 = vector.load %arg12[%c0_53, %c1_54, %c0_55, %c0_56] : memref<1x4x8x8xbf16, #tpu.memory_space<vmem>>, vector<1x1x8x8xbf16>
      %92 = vector.shape_cast %91 : vector<1x1x8x8xbf16> to vector<8x8xbf16>
      %93 = vector.shape_cast %90 : vector<8x8xbf16> to vector<1x1x8x8xbf16>
      tpu.vector_store %arg12[%c0_53, %c1_54, %c0_55, %c0_56], %93 {strides = array<i32>} : memref<1x4x8x8xbf16, #tpu.memory_space<vmem>>, vector<1x1x8x8xbf16>,
      %94 = vector.extract_strided_slice %19 {offsets = [0, 8], sizes = [8, 8], strides = [1, 1]} : vector<8x32xf32> to vector<8x8xf32>
      %95 = arith.truncf %94 : vector<8x8xf32> to vector<8x8xbf16>
      %c0_57 = arith.constant 0 : index
      %c1_58 = arith.constant 1 : index
      %c0_59 = arith.constant 0 : index
      %c0_60 = arith.constant 0 : index
      %96 = vector.load %arg13[%c0_57, %c1_58, %c0_59, %c0_60] : memref<1x4x8x8xbf16, #tpu.memory_space<vmem>>, vector<1x1x8x8xbf16>
      %97 = vector.shape_cast %96 : vector<1x1x8x8xbf16> to vector<8x8xbf16>
      %98 = vector.shape_cast %95 : vector<8x8xbf16> to vector<1x1x8x8xbf16>
      tpu.vector_store %arg13[%c0_57, %c1_58, %c0_59, %c0_60], %98 {strides = array<i32>} : memref<1x4x8x8xbf16, #tpu.memory_space<vmem>>, vector<1x1x8x8xbf16>,
      %99 = vector.extract_strided_slice %60 {offsets = [0, 8], sizes = [8, 8], strides = [1, 1]} : vector<8x32xf32> to vector<8x8xf32>
      %c0_61 = arith.constant 0 : index
      %c0_62 = arith.constant 0 : index
      %c1_63 = arith.constant 1 : index
      %c0_64 = arith.constant 0 : index
      %100 = vector.load %arg14[%c0_61, %c0_62, %c1_63, %c0_64] : memref<1x8x4x8xf32, #tpu.memory_space<vmem>>, vector<1x8x1x8xf32>
      %101 = vector.shape_cast %100 : vector<1x8x1x8xf32> to vector<8x8xf32>
      %102 = vector.shape_cast %99 : vector<8x8xf32> to vector<1x8x1x8xf32>
      tpu.vector_store %arg14[%c0_61, %c0_62, %c1_63, %c0_64], %102 {strides = array<i32>} : memref<1x8x4x8xf32, #tpu.memory_space<vmem>>, vector<1x8x1x8xf32>,
      %103 = vector.extract_strided_slice %19 {offsets = [0, 8], sizes = [8, 8], strides = [1, 1]} : vector<8x32xf32> to vector<8x8xf32>
      %c0_65 = arith.constant 0 : index
      %c0_66 = arith.constant 0 : index
      %c1_67 = arith.constant 1 : index
      %c0_68 = arith.constant 0 : index
      %104 = vector.load %arg15[%c0_65, %c0_66, %c1_67, %c0_68] : memref<1x8x4x8xf32, #tpu.memory_space<vmem>>, vector<1x8x1x8xf32>
      %105 = vector.shape_cast %104 : vector<1x8x1x8xf32> to vector<8x8xf32>
      %106 = vector.shape_cast %103 : vector<8x8xf32> to vector<1x8x1x8xf32>
      tpu.vector_store %arg15[%c0_65, %c0_66, %c1_67, %c0_68], %106 {strides = array<i32>} : memref<1x8x4x8xf32, #tpu.memory_space<vmem>>, vector<1x8x1x8xf32>,
      %107 = vector.extract_strided_slice %49 {offsets = [0, 16], sizes = [8, 8], strides = [1, 1]} : vector<8x32xf32> to vector<8x8xf32>
      %108 = arith.truncf %107 : vector<8x8xf32> to vector<8x8xbf16>
      %c0_69 = arith.constant 0 : index
      %c2 = arith.constant 2 : index
      %c0_70 = arith.constant 0 : index
      %c0_71 = arith.constant 0 : index
      %109 = vector.load %arg11[%c0_69, %c2, %c0_70, %c0_71] : memref<1x4x8x8xbf16, #tpu.memory_space<vmem>>, vector<1x1x8x8xbf16>
      %110 = vector.shape_cast %109 : vector<1x1x8x8xbf16> to vector<8x8xbf16>
      %111 = vector.shape_cast %108 : vector<8x8xbf16> to vector<1x1x8x8xbf16>
      tpu.vector_store %arg11[%c0_69, %c2, %c0_70, %c0_71], %111 {strides = array<i32>} : memref<1x4x8x8xbf16, #tpu.memory_space<vmem>>, vector<1x1x8x8xbf16>,
      %112 = vector.extract_strided_slice %60 {offsets = [0, 16], sizes = [8, 8], strides = [1, 1]} : vector<8x32xf32> to vector<8x8xf32>
      %113 = arith.truncf %112 : vector<8x8xf32> to vector<8x8xbf16>
      %c0_72 = arith.constant 0 : index
      %c2_73 = arith.constant 2 : index
      %c0_74 = arith.constant 0 : index
      %c0_75 = arith.constant 0 : index
      %114 = vector.load %arg12[%c0_72, %c2_73, %c0_74, %c0_75] : memref<1x4x8x8xbf16, #tpu.memory_space<vmem>>, vector<1x1x8x8xbf16>
      %115 = vector.shape_cast %114 : vector<1x1x8x8xbf16> to vector<8x8xbf16>
      %116 = vector.shape_cast %113 : vector<8x8xbf16> to vector<1x1x8x8xbf16>
      tpu.vector_store %arg12[%c0_72, %c2_73, %c0_74, %c0_75], %116 {strides = array<i32>} : memref<1x4x8x8xbf16, #tpu.memory_space<vmem>>, vector<1x1x8x8xbf16>,
      %117 = vector.extract_strided_slice %19 {offsets = [0, 16], sizes = [8, 8], strides = [1, 1]} : vector<8x32xf32> to vector<8x8xf32>
      %118 = arith.truncf %117 : vector<8x8xf32> to vector<8x8xbf16>
      %c0_76 = arith.constant 0 : index
      %c2_77 = arith.constant 2 : index
      %c0_78 = arith.constant 0 : index
      %c0_79 = arith.constant 0 : index
      %119 = vector.load %arg13[%c0_76, %c2_77, %c0_78, %c0_79] : memref<1x4x8x8xbf16, #tpu.memory_space<vmem>>, vector<1x1x8x8xbf16>
      %120 = vector.shape_cast %119 : vector<1x1x8x8xbf16> to vector<8x8xbf16>
      %121 = vector.shape_cast %118 : vector<8x8xbf16> to vector<1x1x8x8xbf16>
      tpu.vector_store %arg13[%c0_76, %c2_77, %c0_78, %c0_79], %121 {strides = array<i32>} : memref<1x4x8x8xbf16, #tpu.memory_space<vmem>>, vector<1x1x8x8xbf16>,
      %122 = vector.extract_strided_slice %60 {offsets = [0, 16], sizes = [8, 8], strides = [1, 1]} : vector<8x32xf32> to vector<8x8xf32>
      %c0_80 = arith.constant 0 : index
      %c0_81 = arith.constant 0 : index
      %c2_82 = arith.constant 2 : index
      %c0_83 = arith.constant 0 : index
      %123 = vector.load %arg14[%c0_80, %c0_81, %c2_82, %c0_83] : memref<1x8x4x8xf32, #tpu.memory_space<vmem>>, vector<1x8x1x8xf32>
      %124 = vector.shape_cast %123 : vector<1x8x1x8xf32> to vector<8x8xf32>
      %125 = vector.shape_cast %122 : vector<8x8xf32> to vector<1x8x1x8xf32>
      tpu.vector_store %arg14[%c0_80, %c0_81, %c2_82, %c0_83], %125 {strides = array<i32>} : memref<1x8x4x8xf32, #tpu.memory_space<vmem>>, vector<1x8x1x8xf32>,
      %126 = vector.extract_strided_slice %19 {offsets = [0, 16], sizes = [8, 8], strides = [1, 1]} : vector<8x32xf32> to vector<8x8xf32>
      %c0_84 = arith.constant 0 : index
      %c0_85 = arith.constant 0 : index
      %c2_86 = arith.constant 2 : index
      %c0_87 = arith.constant 0 : index
      %127 = vector.load %arg15[%c0_84, %c0_85, %c2_86, %c0_87] : memref<1x8x4x8xf32, #tpu.memory_space<vmem>>, vector<1x8x1x8xf32>
      %128 = vector.shape_cast %127 : vector<1x8x1x8xf32> to vector<8x8xf32>
      %129 = vector.shape_cast %126 : vector<8x8xf32> to vector<1x8x1x8xf32>
      tpu.vector_store %arg15[%c0_84, %c0_85, %c2_86, %c0_87], %129 {strides = array<i32>} : memref<1x8x4x8xf32, #tpu.memory_space<vmem>>, vector<1x8x1x8xf32>,
      %130 = vector.extract_strided_slice %49 {offsets = [0, 24], sizes = [8, 8], strides = [1, 1]} : vector<8x32xf32> to vector<8x8xf32>
      %131 = arith.truncf %130 : vector<8x8xf32> to vector<8x8xbf16>
      %c0_88 = arith.constant 0 : index
      %c3 = arith.constant 3 : index
      %c0_89 = arith.constant 0 : index
      %c0_90 = arith.constant 0 : index
      %132 = vector.load %arg11[%c0_88, %c3, %c0_89, %c0_90] : memref<1x4x8x8xbf16, #tpu.memory_space<vmem>>, vector<1x1x8x8xbf16>
      %133 = vector.shape_cast %132 : vector<1x1x8x8xbf16> to vector<8x8xbf16>
      %134 = vector.shape_cast %131 : vector<8x8xbf16> to vector<1x1x8x8xbf16>
      tpu.vector_store %arg11[%c0_88, %c3, %c0_89, %c0_90], %134 {strides = array<i32>} : memref<1x4x8x8xbf16, #tpu.memory_space<vmem>>, vector<1x1x8x8xbf16>,
      %135 = vector.extract_strided_slice %60 {offsets = [0, 24], sizes = [8, 8], strides = [1, 1]} : vector<8x32xf32> to vector<8x8xf32>
      %136 = arith.truncf %135 : vector<8x8xf32> to vector<8x8xbf16>
      %c0_91 = arith.constant 0 : index
      %c3_92 = arith.constant 3 : index
      %c0_93 = arith.constant 0 : index
      %c0_94 = arith.constant 0 : index
      %137 = vector.load %arg12[%c0_91, %c3_92, %c0_93, %c0_94] : memref<1x4x8x8xbf16, #tpu.memory_space<vmem>>, vector<1x1x8x8xbf16>
      %138 = vector.shape_cast %137 : vector<1x1x8x8xbf16> to vector<8x8xbf16>
      %139 = vector.shape_cast %136 : vector<8x8xbf16> to vector<1x1x8x8xbf16>
      tpu.vector_store %arg12[%c0_91, %c3_92, %c0_93, %c0_94], %139 {strides = array<i32>} : memref<1x4x8x8xbf16, #tpu.memory_space<vmem>>, vector<1x1x8x8xbf16>,
      %140 = vector.extract_strided_slice %19 {offsets = [0, 24], sizes = [8, 8], strides = [1, 1]} : vector<8x32xf32> to vector<8x8xf32>
      %141 = arith.truncf %140 : vector<8x8xf32> to vector<8x8xbf16>
      %c0_95 = arith.constant 0 : index
      %c3_96 = arith.constant 3 : index
      %c0_97 = arith.constant 0 : index
      %c0_98 = arith.constant 0 : index
      %142 = vector.load %arg13[%c0_95, %c3_96, %c0_97, %c0_98] : memref<1x4x8x8xbf16, #tpu.memory_space<vmem>>, vector<1x1x8x8xbf16>
      %143 = vector.shape_cast %142 : vector<1x1x8x8xbf16> to vector<8x8xbf16>
      %144 = vector.shape_cast %141 : vector<8x8xbf16> to vector<1x1x8x8xbf16>
      tpu.vector_store %arg13[%c0_95, %c3_96, %c0_97, %c0_98], %144 {strides = array<i32>} : memref<1x4x8x8xbf16, #tpu.memory_space<vmem>>, vector<1x1x8x8xbf16>,
      %145 = vector.extract_strided_slice %60 {offsets = [0, 24], sizes = [8, 8], strides = [1, 1]} : vector<8x32xf32> to vector<8x8xf32>
      %c0_99 = arith.constant 0 : index
      %c0_100 = arith.constant 0 : index
      %c3_101 = arith.constant 3 : index
      %c0_102 = arith.constant 0 : index
      %146 = vector.load %arg14[%c0_99, %c0_100, %c3_101, %c0_102] : memref<1x8x4x8xf32, #tpu.memory_space<vmem>>, vector<1x8x1x8xf32>
      %147 = vector.shape_cast %146 : vector<1x8x1x8xf32> to vector<8x8xf32>
      %148 = vector.shape_cast %145 : vector<8x8xf32> to vector<1x8x1x8xf32>
      tpu.vector_store %arg14[%c0_99, %c0_100, %c3_101, %c0_102], %148 {strides = array<i32>} : memref<1x8x4x8xf32, #tpu.memory_space<vmem>>, vector<1x8x1x8xf32>,
      %149 = vector.extract_strided_slice %19 {offsets = [0, 24], sizes = [8, 8], strides = [1, 1]} : vector<8x32xf32> to vector<8x8xf32>
      %c0_103 = arith.constant 0 : index
      %c0_104 = arith.constant 0 : index
      %c3_105 = arith.constant 3 : index
      %c0_106 = arith.constant 0 : index
      %150 = vector.load %arg15[%c0_103, %c0_104, %c3_105, %c0_106] : memref<1x8x4x8xf32, #tpu.memory_space<vmem>>, vector<1x8x1x8xf32>
      %151 = vector.shape_cast %150 : vector<1x8x1x8xf32> to vector<8x8xf32>
      %152 = vector.shape_cast %149 : vector<8x8xf32> to vector<1x8x1x8xf32>
      tpu.vector_store %arg15[%c0_103, %c0_104, %c3_105, %c0_106], %152 {strides = array<i32>} : memref<1x8x4x8xf32, #tpu.memory_space<vmem>>, vector<1x8x1x8xf32>,
    } else {
    }
    return
  }
  func.func @transform_0(%arg0: i32, %arg1: i32, %arg2: i32, %arg3: i32) -> (i32, i32, i32) {
    %c0_i32 = arith.constant 0 : i32
    return %arg0, %arg1, %arg3 : i32, i32, i32
  }
  func.func @transform_1(%arg0: i32, %arg1: i32, %arg2: i32, %arg3: i32) -> (i32, i32) {
    %c0_i32 = arith.constant 0 : i32
    return %arg3, %arg2 : i32, i32
  }
  func.func @transform_2(%arg0: i32, %arg1: i32, %arg2: i32, %arg3: i32) -> (i32, i32) {
    %c0_i32 = arith.constant 0 : i32
    %c0_i32_0 = arith.constant 0 : i32
    return %c0_i32, %arg2 : i32, i32
  }
  func.func @transform_3(%arg0: i32, %arg1: i32, %arg2: i32, %arg3: i32) -> (i32, i32, i32) {
    %c0_i32 = arith.constant 0 : i32
    %c0_i32_0 = arith.constant 0 : i32
    return %arg0, %arg1, %c0_i32 : i32, i32, i32
  }
  func.func @transform_4(%arg0: i32, %arg1: i32, %arg2: i32, %arg3: i32) -> (i32, i32, i32) {
    %c0_i32 = arith.constant 0 : i32
    %c0_i32_0 = arith.constant 0 : i32
    return %arg0, %arg1, %c0_i32 : i32, i32, i32
  }
  func.func @transform_5(%arg0: i32, %arg1: i32, %arg2: i32, %arg3: i32) -> (i32, i32, i32) {
    %c0_i32 = arith.constant 0 : i32
    %c0_i32_0 = arith.constant 0 : i32
    return %arg0, %arg1, %c0_i32 : i32, i32, i32
  }
  func.func @transform_6(%arg0: i32, %arg1: i32, %arg2: i32, %arg3: i32) -> (i32, i32, i32) {
    %c0_i32 = arith.constant 0 : i32
    %c0_i32_0 = arith.constant 0 : i32
    return %arg0, %arg1, %c0_i32 : i32, i32, i32
  }
  func.func @transform_7(%arg0: i32, %arg1: i32, %arg2: i32, %arg3: i32) -> (i32, i32, i32, i32) {
    %c0_i32 = arith.constant 0 : i32
    %c0_i32_0 = arith.constant 0 : i32
    return %arg0, %arg2, %arg1, %c0_i32 : i32, i32, i32, i32
  }
  func.func @transform_8(%arg0: i32, %arg1: i32, %arg2: i32, %arg3: i32) -> (i32, i32, i32, i32) {
    %c0_i32 = arith.constant 0 : i32
    %c0_i32_0 = arith.constant 0 : i32
    return %arg0, %arg2, %arg1, %c0_i32 : i32, i32, i32, i32
  }
  func.func @transform_9(%arg0: i32, %arg1: i32, %arg2: i32, %arg3: i32) -> (i32, i32, i32, i32) {
    %c0_i32 = arith.constant 0 : i32
    %c0_i32_0 = arith.constant 0 : i32
    return %arg0, %arg2, %arg1, %c0_i32 : i32, i32, i32, i32
  }
  func.func @transform_10(%arg0: i32, %arg1: i32, %arg2: i32, %arg3: i32) -> (i32, i32, i32, i32) {
    %c0_i32 = arith.constant 0 : i32
    %c0_i32_0 = arith.constant 0 : i32
    return %arg0, %arg1, %arg2, %c0_i32 : i32, i32, i32, i32
  }
  func.func @transform_11(%arg0: i32, %arg1: i32, %arg2: i32, %arg3: i32) -> (i32, i32, i32, i32) {
    %c0_i32 = arith.constant 0 : i32
    %c0_i32_0 = arith.constant 0 : i32
    return %arg0, %arg1, %arg2, %c0_i32 : i32, i32, i32, i32
  }
}

</mosaic_0001>

<bundles_post_ra>
// kernel: tpu_custom_call.1
= control target key start
LH: loop header
LB: loop body
LE: loop exit
PB: predicated region body
PF: predicated region fallthrough
CT: control target
= control target key end

     0   :  { %s2865_s0 = inlined_call_operand.vmem [shape: bf16[2,8,32], index: 0, kind: input, shape index: {}]   ;;  %s2866_s1 = inlined_call_operand.vmem [shape: bf16[32,96], index: 1, kind: input, shape index: {}]   ;;  %s2867_s2 = inlined_call_operand.vmem [shape: f32[1,96], index: 2, kind: input, shape index: {}]   ;;  %s2868_s3 = inlined_call_operand.vmem [shape: f32[2,8,2], index: 3, kind: input, shape index: {}]   ;;  %s2869_s4 = inlined_call_operand.vmem [shape: f32[2,8,2], index: 4, kind: input, shape index: {}]   ;;  %s2870_s5 = inlined_call_operand.vmem [shape: f32[2,8,2], index: 5, kind: input, shape index: {}]   ;;  %s2871_s6 = inlined_call_operand.vmem [shape: f32[2,8,2], index: 6, kind: input, shape index: {}]   ;;  %s2872_s7 = inlined_call_operand.hbm [shape: bf16[2,4,8,8], index: 7, kind: output, shape index: {0}]   ;;  %s2873_s8 = inlined_call_operand.hbm [shape: bf16[2,4,8,8], index: 8, kind: output, shape index: {1}]   ;;  %s2874_s9 = inlined_call_operand.hbm [shape: bf16[2,4,8,8], index: 9, kind: output, shape index: {2}]   ;;  %s2875_s10 = inlined_call_operand.hbm [shape: f32[2,8,4,8], index: 10, kind: output, shape index: {3}]   ;;  %s2876_s11 = inlined_call_operand.hbm [shape: f32[2,8,4,8], index: 11, kind: output, shape index: {4}]  }
   0x1   :  { %2890 = sst [smem:[#allocation19_spill]] %s2865_s0 }
   0x2   :  { %2891 = sst [smem:[#allocation20_spill]] %s2866_s1 }
   0x3   :  { %2892 = sst [smem:[#allocation21_spill]] %s2867_s2 }
   0x4   :  { %2893 = sst [smem:[#allocation22_spill]] %s2868_s3 }
   0x5   :  { %17 = vsyncpa [#allocation4], 0 }
   0x6   :  { %19 = vsyncpa [#allocation4 + $0x1], 0 }
   0x7   :  { %20 = vsyncpa [#allocation6], 0 }
   0x8   :  { %22 = vsyncpa [#allocation6 + $0x1], 0 }
   0x9   :  { %23 = vsyncpa [#allocation9], 0 }
   0xa   :  { %25 = vsyncpa [#allocation9 + $0x1], 0  ;;  %s2229_s17 = smov 0   ;;  %s2231_s18 = smov 0  }
   0xb   :  { %s2233_s19 = smov 0   ;;  %s2235_s20 = smov 0  }
   0xc   :  { %s2237_s21 = smov 0   ;;  %s2239_s22 = smov 0  }
   0xd LB: > { %2894 = sst [smem:[#allocation14_spill]] %s2124_s19  ;;  %s2878_s23 = sadd.s32 4294967295, %s2136_s22   ;;  %s2136_s22 = sphi %s2239_s22, %s31_s22   ;;  %s2132_s21 = sphi %s2237_s21, %s2917_s21   ;;  %s2128_s20 = sphi %s2235_s20, %s2916_s20   ;;  %s2124_s19 = sphi %s2233_s19, %s2915_s19   ;;  %s2120_s18 = sphi %s2231_s18, %s2919_s18   ;;  %s2116_s17 = sphi %s2229_s17, %s2918_s17  }
   0xe   : > { %2895 = sst [smem:[#allocation15_spill]] %s2132_s21  ;;  %s2877_s24 = sadd.s32 4294967294, %s2136_s22  }
   0xf   : > { %s57_s25 = sadd.s32 1, %s2132_s21  ;;  %s264_s26 = sadd.s32 1, %s2124_s19 }
  0x10   : > { %p59_p0 = scmp.ge.s32.totalorder %s57_s25, 2  ;;  %p274_p1 = scmp.ne.s32.totalorder %s2124_s19, %s2120_s18 }
  0x11   : > { %p275_p2 = scmp.eq.s32.totalorder %s2878_s23, 1  ;;  %p280_p3 = scmp.ne.s32.totalorder %s2120_s18, %s2116_s17 }
  0x12   : > { %s2921_s25 = smov (%p59_p0, %s57_s25), 0  ;;  %p281_p5 = scmp.eq.s32.totalorder %s2877_s24, 1 }
  0x13   : > { %2896 = sst [smem:[#allocation16_spill]] %s2921_s25  ;;  %p2271_p4 = por %p275_p2, %p274_p1 }
  0x14   : > { %s257_s28 = ssub.s32 %s2132_s21, %s2921_s25  ;;  %p1782_p6 = scmp.ge.s32.totalorder %s2136_s22, 1 }
  0x15   : > { %p262_p7 = scmp.eq.s32.totalorder %s257_s28, 0  ;;  %p2280_p8 = por %p281_p5, %p280_p3 }
  0x16   : > { %p490_p9 = scmp.lt.s32.totalorder %s2136_s22, 3 }
  0x17   : > { %s2898_s29 = scalar_select %p2280_p8, 1, 0 }
  0x18   : > { %s2286_s30 = scalar_select %p262_p7, %s2124_s19, %s264_s26  }
  0x19   : > { %2899 = sst [smem:[#allocation17_spill]] %s2898_s29  ;;  %p491_p10 = pnand %p1782_p6, %p490_p9 }
  0x1a   : > { %2900 = sst [smem:[#allocation18_spill]] %s2286_s30  ;;  %p594_p11 = scmp.lt.s32.totalorder (!%p491_p10), %s2128_s20, 1 }
  0x1b   : > { %494 = sbr.rel (%p491_p10) target bundleno = 741 (0x2e5), region = 48  ;;  %s2901_s1 = sld [smem:[#allocation20_spill]] (!%p491_p10) }
  0x1c   : > { %s2902_s3 = sld [smem:[#allocation22_spill]] (!%p491_p10)  ;;  %s2140_s29 = smov (!%p491_p10), 2  }
  0x1d   : > { %s2903_s0 = sld [smem:[#allocation19_spill]] (!%p491_p10)  ;;  %s2141_s23 = smov (!%p491_p10), 6  }
  0x1e   : > { %s2886_s30 = smov (!%p491_p10), 4   ;;  %s2144_s19 = smov (!%p491_p10), 16  }
  0x1f   : > { %s2904_s2 = sld [smem:[#allocation21_spill]] (!%p491_p10)  ;;  %s2147_s13 = smov (!%p491_p10), 94  }
  0x20   : > { %vm654_vm0 = vcmask 785408   ;;  %v2138_v0 = vmov 0.0   ;;  %s595_s16 = scalar_select %p594_p11, %s2128_s20, 1  ;;  %vm2139_vm1 = vmmov 0   ;;  %vm674_vm2 = vcmask 261120  }
  0x21   : > { %655 = vst.msk [vmem:[#allocation2] sm:$0xff] %vm654_vm0, %v2138_v0  ;;  %1837 = vmatprep.subr.bf16.mxu0 %v2138_v0  ;;  %v1946_v1 = vld [vmem:[%s2901_s1 + $0x8] sm:$0xff]   ;;  %v1947_v2 = vld [vmem:[%s2901_s1] sm:$0xff]   ;;  %1841 = vmatprep.mubr.msk.bf16.mxu0 %vm2139_vm1, %v2138_v0  ;;  %vm748_vm3 = vcmask 15360   ;;  %vm750_vm4 = vcmask 31744   ;;  %vm752_vm5 = vcmask 48128   ;;  %v886_v36 = vlaneseq }
  0x22   : > { %1838 = vmatpush3.bf16.msra.mxu0 %v1946_v1  ;;  %s1789_s26 = sshll.u32 %s595_s16, 3  ;;  %s1788_s28 = sshll.u32 %s595_s16, 2  ;;  %v2146_v34 = vmov 1966171168   ;;  %vm784_vm6 = vcmask 64512   ;;  %vm786_vm7 = vcmask 130048  }
  0x23   : > { %1839 = vmatprep.subr.bf16.mxu0 %v2138_v0  ;;  %s622_s25 = scalar_lea.vmem %s2902_s3, %s1789_s26  ;;  %s636_s12 = scalar_lea.vmem %s2870_s5, %s1789_s26  ;;  %v884_v35 = vunpack.c.l.s4 %v2146_v34  ;;  %v887_v38 = vshrl.u32 %v886_v36, 7  ;;  %vm788_vm8 = vcmask 195584   ;;  %vm823_vm9 = vcmask 244736  }
  0x24   : > { %v733_v3 = vld [vmem:[%s622_s25] sm:$0xff]  ;;  %s603_s15 = scalar_lea.vmem %s2903_s0, %s1788_s28  ;;  %s643_s16 = scalar_lea.vmem %s2871_s6, %s1789_s26  ;;  %vm863_vm10 = vcmask 60416   ;;  %vm987_vm11 = vcmask 57344  }
  0x25   : > { %v735_v4 = vld [vmem:[%s636_s12] sm:$0xff]  ;;  %738 = vrot.lane.b32.xlu0 %v733_v3, %s2140_s29  ;;  %s629_s25 = scalar_lea.vmem %s2869_s4, %s1789_s26  ;;  %s2143_s1 = smov 8   ;;  %v885_v37 = vunpack.c.0.s8 %v884_v35  ;;  %v2358_v42 = vsub.s32 0, %v887_v38 }
  0x26   : > { %1840 = vmatpush3.bf16.msra.mxu0 %v1947_v2  ;;  %745 = vrot.lane.b32.xlu1 %v735_v4, %s2141_s23  ;;  %v657_v5 = vld [vmem:[%s603_s15] sm:$0xf]  ;;  %s2145_s26 = smov 24   ;;  %s2148_s14 = smov 126  }
  0x27   : > { %v736_v6 = vld [vmem:[%s643_s16] sm:$0xff]  ;;  %s2149_s15 = smov 66   ;;  %s2150_s16 = smov 98   ;;  %v2347_v39 = vsub.s32 %v885_v37, %v887_v38 }
  0x28   : > { %v755_v7 = vsub.f32 0.0, %v736_v6  ;;  %v734_v8 = vld [vmem:[%s629_s25] sm:$0xff]  ;;  %s2152_s21 = smov 56   ;;  %s2884_s24 = smov 64  }
  0x29   : > { %1842 = vmatmul.mubr.msk.bf16.vlgmr.msra.gmra.mxu0 %vm674_vm2, %v657_v5  ;;  %742 = vrot.lane.b32.xlu0 %v735_v4, %s2886_s30  ;;  %v754_v12 = vsub.f32 0.0, %v734_v8  ;;  %v656_v25 = vld [vmem:[#allocation2] sm:$0xff]  ;;  %s2155_s25 = smov 48  }
  0x2a   : > { %757 = vrot.lane.b32.xlu1 %v755_v7, %s2886_s30  ;;  %v1796_v31 = vld [vmem:[%s2904_s2] ss:$0 sm:$0xff] }
  0x2b   : > { %v760_v17 = vsel %vm748_vm3, %v754_v12, 0.0 }
  0x2d   : > { %764 = vrot.lane.b32.xlu0 %v734_v8, %s2140_s29 }
  0x2e   : > { %768 = vrot.lane.b32.xlu1 %v736_v6, %s2141_s23  ;;  %s2151_s23 = smov 30  }
  0x97   : > { %v739_v9 = vpop.permute.xlu0 %738 }
  0x98   : > { %v746_v10 = vpop.permute.xlu1 %745  ;;  %v749_v11 = vsel %vm748_vm3, %v733_v3, %v739_v9 }
  0x9b   : > { %v743_v13 = vpop.permute.xlu0 %742 }
  0x9c   : > { %v758_v14 = vpop.permute.xlu1 %757  ;;  %v751_v15 = vsel %vm750_vm4, %v749_v11, %v743_v13 }
  0x9d   : > { %v2318_v16 = vsel %vm752_vm5, %v751_v15, %v746_v10  ;;  %v761_v21 = vsel %vm750_vm4, %v760_v17, %v758_v14 }
  0x9e   : > { %775 = vrot.lane.b32.xlu0 %v2318_v16, %s2143_s1  ;;  %v2329_v24 = vsel %vm752_vm5, %v761_v21, 0.0 }
  0x9f   : > { %v765_v18 = vpop.permute.xlu0 %764 }
  0xa0   : > { %v769_v19 = vpop.permute.xlu1 %768  ;;  %v771_v20 = vsel %vm748_vm3, 0.0, %v765_v18 }
  0xa1   : > { %v772_v22 = vsel %vm750_vm4, %v771_v20, 0.0 }
  0xa2   : > { %v2324_v23 = vsel %vm752_vm5, %v772_v22, %v769_v19  ;;  %778 = vrot.lane.b32.xlu0 %v2318_v16, %s2144_s19 }
  0xa3   : > { %807 = vrot.lane.b32.xlu1 %v2324_v23, %s2144_s19 }
  0xa6   : > { %781 = vrot.lane.b32.xlu0 %v2318_v16, %s2145_s26 }
  0xa7   : > { %791 = vrot.lane.b32.xlu1 %v2329_v24, %s2143_s1 }
  0xaa   : > { %804 = vrot.lane.b32.xlu0 %v2324_v23, %s2143_s1  ;;  %s2156_s1 = smov 32  }
  0xab   : > { %794 = vrot.lane.b32.xlu1 %v2329_v24, %s2144_s19  ;;  %s2430_s19 = sand.u32 1, %s2120_s18  }
  0xac   : > { %s2883_s12 = sshll.u32 %s2430_s19, 5 }
  0xae   : > { %810 = vrot.lane.b32.xlu0 %v2324_v23, %s2145_s26 }
  0xaf   : > { %797 = vrot.lane.b32.xlu1 %v2329_v24, %s2145_s26  ;;  %s2435_s26 = sshll.u32 %s2430_s19, 4 }
  0xb0   : > { %s2441_s28 = scalar_lea.vmem [#allocation7], %s2435_s26 }
  0xe9   : > { %v712_v26 = vpop.f32.mrf.mxu0 }
  0xea   : > { %v718_v27 = vadd.f32 %v712_v26, %v656_v25 }
  0xeb   : > { %v1843_v28 = vpop.f32.mrf.mxu0 }
  0xec   : > { %720 = vst.msk [vmem:[#allocation2] sm:$0xff] %vm654_vm0, %v718_v27 }
  0xed   : > { %v715_v29 = vpop.f32.mrf.mxu0 }
  0xef   : > { %v1844_v30 = vpop.f32.mrf.mxu0 }
  0xf3   : > { %v724_v32 = vld [vmem:[#allocation2] sm:$0xff] }
  0xf4   : > { %v2341_v33 = vadd.f32 %v1796_v31, %v724_v32 }
  0xf6   : > { %837 = vrot.lane.b32.xlu0 %v2341_v33, %s2147_s13  ;;  %817 = vrot.lane.b32.xlu1 %v2341_v33, %s2148_s14  ;;  %v1827_v40 = vpack.c.bf16 %v2341_v33, %v2341_v33  ;;  %v1003_v41 = vrot.slane %v2341_v33, %v2347_v39  ;;  %v996_v44 = vcombine.high %v2341_v33, %v2341_v33  ;;  %s2157_s13 = smov 112   ;;  %s2158_s14 = smov 120  }
  0xf8   : > { %v1019_v43 = vrot.slane %v1003_v41, %v2347_v39  ;;  %v1010_v47 = vrot.slane %v996_v44, %v2347_v39  ;;  %v1011_v50 = vcombine.high %v1003_v41, %v1003_v41 }
  0xfa   : > { %841 = vrot.lane.b32.xlu0 %v2341_v33, %s2149_s15  ;;  %825 = vrot.lane.b32.xlu1 %v2341_v33, %s2150_s16  ;;  %v1048_v45 = vrot.slane %v1019_v43, %v2358_v42  ;;  %v1041_v46 = vcombine.high %v1019_v43, %v1019_v43  ;;  %v1026_v49 = vrot.slane %v1010_v47, %v2347_v39  ;;  %s2453_s15 = scalar_lea.vmem [#allocation3], %s2435_s26  ;;  %s2459_s16 = scalar_lea.vmem [#allocation10], %s2883_s12 }
  0xfb   : > { %v1033_v52 = vrot.slane %v1011_v50, %v2347_v39  ;;  %v1012_v57 = vcombine.high %v1010_v47, %v1010_v47 }
  0xfc   : > { %v1056_v48 = vrot.slane %v1041_v46, %v2358_v42  ;;  %v1064_v51 = vrot.slane %v1026_v49, %v2358_v42  ;;  %v1042_v54 = vcombine.high %v1026_v49, %v1026_v49 }
  0xfd   : > { %v1052_v53 = vrot.slane %v1033_v52, %v2358_v42  ;;  %v1043_v56 = vcombine.high %v1033_v52, %v1033_v52  ;;  %v1040_v59 = vrot.slane %v1012_v57, %v2347_v39 }
  0xfe   : > { %828 = vrot.lane.b32.xlu0 %v2341_v33, %s2140_s29  ;;  %820 = vrot.lane.b32.xlu1 %v2341_v33, %s2151_s23  ;;  %s2889_s29 = smov 40   ;;  %v2385_v55 = vrot.slane %v1042_v54, %v2358_v42  ;;  %s2159_s23 = smov 104  }
  0xff   : > { %v1060_v58 = vrot.slane %v1043_v56, %v2358_v42  ;;  %v1068_v60 = vrot.slane %v1040_v59, %v2358_v42  ;;  %v1044_v62 = vcombine.high %v1040_v59, %v1040_v59 }
 0x101   : > { %v2407_v0 = vrot.slane %v1044_v62, %v2358_v42 }
 0x102   : > { %1122 = vrot.lane.b32.xlu0 %v1827_v40, %s2152_s21  ;;  %877 = vrot.lane.b32.xlu1 %v1827_v40, %s2884_s24 }
 0x106   : > { %1280 = vrot.lane.b32.xlu0 %v1827_v40, %s2889_s29  ;;  %1201 = vrot.lane.b32.xlu1 %v1827_v40, %s2155_s25 }
 0x10a   : > { %1077 = vrot.lane.b32.xlu0 %v1048_v45, %s2884_s24  ;;  %1159 = vrot.lane.b32.xlu1 %v1048_v45, %s2152_s21 }
 0x10e   : > { %1081 = vrot.lane.b32.xlu0 %v1056_v48, %s2884_s24  ;;  %1238 = vrot.lane.b32.xlu1 %v1048_v45, %s2155_s25 }
 0x110   : > { %v776_v61 = vpop.permute.xlu0 %775 }
 0x111   : > { %v785_v2 = vsel %vm784_vm6, %v2318_v16, %v776_v61 }
 0x112   : > { %1085 = vrot.lane.b32.xlu0 %v1064_v51, %s2884_s24  ;;  %1317 = vrot.lane.b32.xlu1 %v1048_v45, %s2889_s29 }
 0x114   : > { %v779_v63 = vpop.permute.xlu0 %778 }
 0x115   : > { %v787_v3 = vsel %vm786_vm7, %v785_v2, %v779_v63  ;;  %v808_v5 = vpop.permute.xlu1 %807 }
 0x116   : > { %1161 = vrot.lane.b32.xlu0 %v1052_v53, %s2152_s21  ;;  %1079 = vrot.lane.b32.xlu1 %v1052_v53, %s2884_s24 }
 0x118   : > { %v782_v1 = vpop.permute.xlu0 %781 }
 0x119   : > { %v789_v4 = vsel %vm788_vm8, %v787_v3, %v782_v1  ;;  %v792_v6 = vpop.permute.xlu1 %791 }
 0x11a   : > { %1240 = vrot.lane.b32.xlu0 %v1052_v53, %s2155_s25  ;;  %1163 = vrot.lane.b32.xlu1 %v1056_v48, %s2152_s21  ;;  %v800_v11 = vsel %vm784_vm6, %v2329_v24, %v792_v6  ;;  %v832_v29 = vmul.f32 %v789_v4, %v2341_v33 }
 0x11c   : > { %v805_v7 = vpop.permute.xlu0 %804 }
 0x11d   : > { %v795_v8 = vpop.permute.xlu1 %794  ;;  %v813_v15 = vsel %vm784_vm6, %v2324_v23, %v805_v7 }
 0x11e   : > { %1319 = vrot.lane.b32.xlu0 %v1052_v53, %s2889_s29  ;;  %1167 = vrot.lane.b32.xlu1 %v1064_v51, %s2152_s21  ;;  %v801_v12 = vsel %vm786_vm7, %v800_v11, %v795_v8  ;;  %v814_v19 = vsel %vm786_vm7, %v813_v15, %v808_v5 }
 0x120   : > { %v811_v9 = vpop.permute.xlu0 %810 }
 0x121   : > { %v798_v10 = vpop.permute.xlu1 %797  ;;  %v815_v22 = vsel %vm788_vm8, %v814_v19, %v811_v9 }
 0x122   : > { %1089 = vrot.lane.b32.xlu0 %v2385_v55, %s2884_s24  ;;  %1242 = vrot.lane.b32.xlu1 %v1056_v48, %s2155_s25  ;;  %v802_v16 = vsel %vm788_vm8, %v801_v12, %v798_v10 }
 0x126   : > { %1165 = vrot.lane.b32.xlu0 %v1060_v58, %s2152_s21  ;;  %1246 = vrot.lane.b32.xlu1 %v1064_v51, %s2155_s25 }
 0x12a   : > { %1169 = vrot.lane.b32.xlu0 %v1068_v60, %s2152_s21  ;;  %1321 = vrot.lane.b32.xlu1 %v1056_v48, %s2889_s29 }
 0x12e   : > { %1244 = vrot.lane.b32.xlu0 %v1060_v58, %s2155_s25  ;;  %1325 = vrot.lane.b32.xlu1 %v1064_v51, %s2889_s29 }
 0x132   : > { %1248 = vrot.lane.b32.xlu0 %v1068_v60, %s2155_s25  ;;  %1083 = vrot.lane.b32.xlu1 %v1060_v58, %s2884_s24 }
 0x136   : > { %1323 = vrot.lane.b32.xlu0 %v1060_v58, %s2889_s29  ;;  %1087 = vrot.lane.b32.xlu1 %v1068_v60, %s2884_s24 }
 0x13a   : > { %1327 = vrot.lane.b32.xlu0 %v1068_v60, %s2889_s29  ;;  %1171 = vrot.lane.b32.xlu1 %v2385_v55, %s2152_s21 }
 0x13e   : > { %1173 = vrot.lane.b32.xlu0 %v2407_v0, %s2152_s21  ;;  %1250 = vrot.lane.b32.xlu1 %v2385_v55, %s2155_s25  ;;  %s2160_s21 = smov 88  }
 0x142   : > { %1252 = vrot.lane.b32.xlu0 %v2407_v0, %s2155_s25  ;;  %1091 = vrot.lane.b32.xlu1 %v2407_v0, %s2884_s24  ;;  %s2161_s25 = smov 96  }
 0x146   : > { %846 = vrot.lane.b32.xlu1 %v789_v4, %s2156_s1 }
 0x168   : > { %v838_v13 = vpop.permute.xlu0 %837  ;;  %v818_v14 = vpop.permute.xlu1 %817 }
 0x169   : > { %v840_v17 = vsel %vm823_vm9, %v838_v13, %v818_v14 }
 0x16a   : > { %v850_v18 = vmul.f32 %v840_v17, %v802_v16 }
 0x16c   : > { %v842_v20 = vpop.permute.xlu0 %841  ;;  %v826_v21 = vpop.permute.xlu1 %825  ;;  %852 = vrot.lane.b32.xlu0 %v850_v18, %s2156_s1 }
 0x16d   : > { %v844_v24 = vsel %vm748_vm3, %v842_v20, %v826_v21 }
 0x16e   : > { %v856_v25 = vmul.f32 %v844_v24, %v815_v22 }
 0x170   : > { %v829_v23 = vpop.permute.xlu0 %828  ;;  %v821_v26 = vpop.permute.xlu1 %820  ;;  %858 = vrot.lane.b32.xlu1 %v856_v25, %s2156_s1  ;;  %s2162_s1 = smov 80  }
 0x171   : > { %v831_v27 = vsel %vm748_vm3, %v826_v21, %v829_v23  ;;  %v824_v28 = vsel %vm823_vm9, %v818_v14, %v821_v26 }
 0x172   : > { %v833_v30 = vmul.f32 %v824_v28, %v802_v16  ;;  %v835_v31 = vmul.f32 %v831_v27, %v815_v22 }
 0x174   : > { %v834_v32 = vadd.f32 %v833_v30, %v832_v29  ;;  %v1123_v34 = vpop.permute.xlu0 %1122  ;;  %v878_v35 = vpop.permute.xlu1 %877 }
 0x175   : > { %1802 = vst.msk [vmem:[%s2441_s28 + $0x4] sm:$0xf] %vm863_vm10, %v1123_v34  ;;  %880 = vst.msk [vmem:[%s2441_s28] sm:$0xf] %vm863_vm10, %v878_v35 }
 0x176   : > { %v836_v36 = vadd.f32 %v835_v31, %v834_v32 }
 0x178   : > { %v862_v37 = vpack.c.bf16 %v836_v36, %v836_v36  ;;  %v1281_v38 = vpop.permute.xlu0 %1280  ;;  %v1202_v40 = vpop.permute.xlu1 %1201 }
 0x179   : > { %1808 = vst.msk [vmem:[%s2441_s28 + $0xc] sm:$0xf] %vm863_vm10, %v1281_v38  ;;  %1805 = vst.msk [vmem:[%s2441_s28 + $0x8] sm:$0xf] %vm863_vm10, %v1202_v40 }
 0x17a   : > { %1191 = vrot.lane.b32.xlu1 %v862_v37, %s2157_s13  ;;  %1112 = vrot.lane.b32.xlu0 %v862_v37, %s2158_s14  ;;  %864 = vst.msk [vmem:[%s2453_s15] sm:$0xf] %vm863_vm10, %v862_v37  ;;  %s2888_s13 = smov 72   ;;  %s1386_s14 = sshll.u32 %s2453_s15, 4  ;;  %s2580_s14 = int_to_ptr.vmem [resolvable:$true] %s1386_s14 }
 0x17c   : > { %v1078_v41 = vpop.permute.xlu0 %1077  ;;  %v1160_v43 = vpop.permute.xlu1 %1159 }
 0x17d   : > { %1101 = vst.msk [vmem:[%s2459_s16] sm:$0x1] %vm987_vm11, %v1078_v41  ;;  %1183 = vst.msk [vmem:[%s2459_s16 + $0x1] sm:$0x1] %vm987_vm11, %v1160_v43 }
 0x17e   : > { %1270 = vrot.lane.b32.xlu1 %v862_v37, %s2159_s23  ;;  %s2577_s23 = sshll.u32 %s2128_s20, 8 }
 0x17f   : > { %s2586_s30 = scalar_lea.hbm %s2872_s7, %s2577_s23 }
 0x180   : > { %v1082_v44 = vpop.permute.xlu0 %1081  ;;  %v1239_v45 = vpop.permute.xlu1 %1238 }
 0x181   : > { %1103 = vst.msk [vmem:[%s2459_s16 + $0x8] sm:$0x1] %vm987_vm11, %v1082_v44  ;;  %1262 = vst.msk [vmem:[%s2459_s16 + $0x2] sm:$0x1] %vm987_vm11, %v1239_v45 }
 0x184   : > { %v1086_v46 = vpop.permute.xlu0 %1085  ;;  %v1318_v47 = vpop.permute.xlu1 %1317 }
 0x185   : > { %1105 = vst.msk [vmem:[%s2459_s16 + $0x10] sm:$0x1] %vm987_vm11, %v1086_v46  ;;  %1341 = vst.msk [vmem:[%s2459_s16 + $0x3] sm:$0x1] %vm987_vm11, %v1318_v47 }
 0x188   : > { %v1162_v48 = vpop.permute.xlu0 %1161  ;;  %v1080_v49 = vpop.permute.xlu1 %1079 }
 0x189   : > { %1184 = vst.msk [vmem:[%s2459_s16 + $0x5] sm:$0x1] %vm987_vm11, %v1162_v48  ;;  %1102 = vst.msk [vmem:[%s2459_s16 + $0x4] sm:$0x1] %vm987_vm11, %v1080_v49 }
 0x18c   : > { %v1241_v50 = vpop.permute.xlu0 %1240  ;;  %v1164_v51 = vpop.permute.xlu1 %1163 }
 0x18d   : > { %1263 = vst.msk [vmem:[%s2459_s16 + $0x6] sm:$0x1] %vm987_vm11, %v1241_v50  ;;  %1185 = vst.msk [vmem:[%s2459_s16 + $0x9] sm:$0x1] %vm987_vm11, %v1164_v51 }
 0x190   : > { %v1320_v52 = vpop.permute.xlu0 %1319  ;;  %v1168_v53 = vpop.permute.xlu1 %1167 }
 0x191   : > { %1342 = vst.msk [vmem:[%s2459_s16 + $0x7] sm:$0x1] %vm987_vm11, %v1320_v52  ;;  %1187 = vst.msk [vmem:[%s2459_s16 + $0x11] sm:$0x1] %vm987_vm11, %v1168_v53 }
 0x194   : > { %v1090_v54 = vpop.permute.xlu0 %1089  ;;  %v1243_v56 = vpop.permute.xlu1 %1242 }
 0x195   : > { %1107 = vst.msk [vmem:[%s2459_s16 + $0x18] sm:$0x1] %vm987_vm11, %v1090_v54  ;;  %1264 = vst.msk [vmem:[%s2459_s16 + $0xa] sm:$0x1] %vm987_vm11, %v1243_v56 }
 0x198   : > { %v1166_v57 = vpop.permute.xlu0 %1165  ;;  %v1247_v58 = vpop.permute.xlu1 %1246 }
 0x199   : > { %1186 = vst.msk [vmem:[%s2459_s16 + $0xd] sm:$0x1] %vm987_vm11, %v1166_v57  ;;  %1266 = vst.msk [vmem:[%s2459_s16 + $0x12] sm:$0x1] %vm987_vm11, %v1247_v58 }
 0x19c   : > { %v1170_v59 = vpop.permute.xlu0 %1169  ;;  %v1322_v60 = vpop.permute.xlu1 %1321 }
 0x19d   : > { %1188 = vst.msk [vmem:[%s2459_s16 + $0x15] sm:$0x1] %vm987_vm11, %v1170_v59  ;;  %1343 = vst.msk [vmem:[%s2459_s16 + $0xb] sm:$0x1] %vm987_vm11, %v1322_v60 }
 0x1a0   : > { %v1245_v61 = vpop.permute.xlu0 %1244  ;;  %v1326_v62 = vpop.permute.xlu1 %1325 }
 0x1a1   : > { %1265 = vst.msk [vmem:[%s2459_s16 + $0xe] sm:$0x1] %vm987_vm11, %v1245_v61  ;;  %1345 = vst.msk [vmem:[%s2459_s16 + $0x13] sm:$0x1] %vm987_vm11, %v1326_v62 }
 0x1a4   : > { %v1249_v63 = vpop.permute.xlu0 %1248  ;;  %v1084_v1 = vpop.permute.xlu1 %1083 }
 0x1a5   : > { %1267 = vst.msk [vmem:[%s2459_s16 + $0x16] sm:$0x1] %vm987_vm11, %v1249_v63  ;;  %1104 = vst.msk [vmem:[%s2459_s16 + $0xc] sm:$0x1] %vm987_vm11, %v1084_v1 }
 0x1a8   : > { %v1324_v2 = vpop.permute.xlu0 %1323  ;;  %v1088_v3 = vpop.permute.xlu1 %1087 }
 0x1a9   : > { %1344 = vst.msk [vmem:[%s2459_s16 + $0xf] sm:$0x1] %vm987_vm11, %v1324_v2  ;;  %1106 = vst.msk [vmem:[%s2459_s16 + $0x14] sm:$0x1] %vm987_vm11, %v1088_v3 }
 0x1ac   : > { %v1328_v4 = vpop.permute.xlu0 %1327  ;;  %v1172_v5 = vpop.permute.xlu1 %1171 }
 0x1ad   : > { %1346 = vst.msk [vmem:[%s2459_s16 + $0x17] sm:$0x1] %vm987_vm11, %v1328_v4  ;;  %1189 = vst.msk [vmem:[%s2459_s16 + $0x19] sm:$0x1] %vm987_vm11, %v1172_v5 }
 0x1b0   : > { %v1174_v6 = vpop.permute.xlu0 %1173  ;;  %v1251_v7 = vpop.permute.xlu1 %1250 }
 0x1b1   : > { %1190 = vst.msk [vmem:[%s2459_s16 + $0x1d] sm:$0x1] %vm987_vm11, %v1174_v6  ;;  %1268 = vst.msk [vmem:[%s2459_s16 + $0x1a] sm:$0x1] %vm987_vm11, %v1251_v7 }
 0x1b4   : > { %v1253_v8 = vpop.permute.xlu0 %1252  ;;  %v1092_v9 = vpop.permute.xlu1 %1091 }
 0x1b5   : > { %1269 = vst.msk [vmem:[%s2459_s16 + $0x1e] sm:$0x1] %vm987_vm11, %v1253_v8  ;;  %1108 = vst.msk [vmem:[%s2459_s16 + $0x1c] sm:$0x1] %vm987_vm11, %v1092_v9 }
 0x1b8   : > { %v847_v10 = vpop.permute.xlu1 %846 }
 0x1b9   : > { %v849_v12 = vmul.f32 %v847_v10, %v2341_v33 }
 0x1de   : > { %v853_v11 = vpop.permute.xlu0 %852 }
 0x1df   : > { %v855_v13 = vadd.f32 %v853_v11, %v849_v12 }
 0x1e2   : > { %v859_v14 = vpop.permute.xlu1 %858 }
 0x1e3   : > { %v861_v15 = vadd.f32 %v859_v14, %v855_v13 }
 0x1e5   : > { %v1826_v16 = vpack.c.bf16 %v861_v15, %v861_v15  ;;  %v889_v17 = vrot.slane %v861_v15, %v2347_v39  ;;  %v882_v22 = vcombine.high %v861_v15, %v861_v15 }
 0x1e7   : > { %v905_v18 = vrot.slane %v889_v17, %v2347_v39  ;;  %1117 = vrot.lane.b32.xlu1 %v1826_v16, %s2160_s21  ;;  %869 = vrot.lane.b32.xlu0 %v1826_v16, %s2161_s25  ;;  %v897_v19 = vcombine.high %v889_v17, %v889_v17  ;;  %v896_v23 = vrot.slane %v882_v22, %v2347_v39 }
 0x1e9   : > { %v934_v33 = vrot.slane %v905_v18, %v2358_v42  ;;  %v919_v24 = vrot.slane %v897_v19, %v2347_v39  ;;  %v927_v26 = vcombine.high %v905_v18, %v905_v18  ;;  %v912_v28 = vrot.slane %v896_v23, %v2347_v39 }
 0x1ea   : > { %v898_v31 = vcombine.high %v896_v23, %v896_v23 }
 0x1eb   : > { %1196 = vrot.lane.b32.xlu0 %v1826_v16, %s2162_s1  ;;  %1127 = vrot.lane.b32.xlu1 %v934_v33, %s2160_s21  ;;  %v938_v27 = vrot.slane %v919_v24, %v2358_v42  ;;  %v942_v29 = vrot.slane %v927_v26, %v2358_v42  ;;  %v950_v30 = vrot.slane %v912_v28, %v2358_v42 }
 0x1ec   : > { %v1192_v20 = vpop.permute.xlu1 %1191  ;;  %v1113_v21 = vpop.permute.xlu0 %1112  ;;  %v929_v32 = vcombine.high %v919_v24, %v919_v24  ;;  %v926_v35 = vrot.slane %v898_v31, %v2347_v39  ;;  %v928_v36 = vcombine.high %v912_v28, %v912_v28 }
 0x1ed   : > { %1803 = vst.msk [vmem:[%s2453_s15 + $0x8] sm:$0xf] %vm863_vm10, %v1192_v20  ;;  %1800 = vst.msk [vmem:[%s2453_s15 + $0x4] sm:$0xf] %vm863_vm10, %v1113_v21 }
 0x1ee   : > { %v946_v34 = vrot.slane %v929_v32, %v2358_v42  ;;  %v954_v37 = vrot.slane %v926_v35, %v2358_v42  ;;  %v958_v38 = vrot.slane %v928_v36, %v2358_v42  ;;  %v930_v39 = vcombine.high %v926_v35, %v926_v35 }
 0x1ef   : > { %1275 = vrot.lane.b32.xlu0 %v1826_v16, %s2888_s13  ;;  %1285 = vrot.lane.b32.xlu1 %v934_v33, %s2888_s13 }
 0x1f0   : > { %v1271_v25 = vpop.permute.xlu1 %1270  ;;  %v962_v40 = vrot.slane %v930_v39, %v2358_v42 }
 0x1f1   : > { %1806 = vst.msk [vmem:[%s2453_s15 + $0xc] sm:$0xf] %vm863_vm10, %v1271_v25  ;;  %s1350_s15 = scalar_lea.sflag [#allocation4], %s2430_s19 }
 0x1f3   : > { %963 = vrot.lane.b32.xlu0 %v934_v33, %s2161_s25  ;;  %965 = vrot.lane.b32.xlu1 %v938_v27, %s2161_s25 }
 0x1f7   : > { %1206 = vrot.lane.b32.xlu0 %v934_v33, %s2162_s1  ;;  %1131 = vrot.lane.b32.xlu1 %v942_v29, %s2160_s21 }
 0x1fb   : > { %967 = vrot.lane.b32.xlu0 %v942_v29, %s2161_s25  ;;  %1135 = vrot.lane.b32.xlu1 %v950_v30, %s2160_s21 }
 0x1ff   : > { %971 = vrot.lane.b32.xlu0 %v950_v30, %s2161_s25  ;;  %1208 = vrot.lane.b32.xlu1 %v938_v27, %s2162_s1 }
 0x203   : > { %1129 = vrot.lane.b32.xlu0 %v938_v27, %s2160_s21  ;;  %1289 = vrot.lane.b32.xlu1 %v942_v29, %s2888_s13 }
 0x207   : > { %1210 = vrot.lane.b32.xlu0 %v942_v29, %s2162_s1  ;;  %1293 = vrot.lane.b32.xlu1 %v950_v30, %s2888_s13 }
 0x20b   : > { %1214 = vrot.lane.b32.xlu0 %v950_v30, %s2162_s1  ;;  %969 = vrot.lane.b32.xlu1 %v946_v34, %s2161_s25 }
 0x20f   : > { %1287 = vrot.lane.b32.xlu0 %v938_v27, %s2888_s13  ;;  %973 = vrot.lane.b32.xlu1 %v954_v37, %s2161_s25 }
 0x213   : > { %975 = vrot.lane.b32.xlu0 %v958_v38, %s2161_s25  ;;  %1139 = vrot.lane.b32.xlu1 %v958_v38, %s2160_s21 }
 0x217   : > { %1133 = vrot.lane.b32.xlu0 %v946_v34, %s2160_s21  ;;  %1212 = vrot.lane.b32.xlu1 %v946_v34, %s2162_s1 }
 0x21b   : > { %1137 = vrot.lane.b32.xlu0 %v954_v37, %s2160_s21  ;;  %1216 = vrot.lane.b32.xlu1 %v954_v37, %s2162_s1 }
 0x21f   : > { %1218 = vrot.lane.b32.xlu0 %v958_v38, %s2162_s1  ;;  %1297 = vrot.lane.b32.xlu1 %v958_v38, %s2888_s13 }
 0x223   : > { %1291 = vrot.lane.b32.xlu0 %v946_v34, %s2888_s13  ;;  %977 = vrot.lane.b32.xlu1 %v962_v40, %s2161_s25  ;;  %s1948_s25 = scalar_lea.vmem %s2580_s14, 256 }
 0x224   : > { %p1949_p12 = scmp.ne.s32.totalorder %s2580_s14, %s1948_s25 }
 0x226   : > { %p1950_p13 = pnand %p1949_p12, %p2271_p4 }
 0x227   : > { %1295 = vrot.lane.b32.xlu0 %v954_v37, %s2888_s13  ;;  %1220 = vrot.lane.b32.xlu1 %v962_v40, %s2162_s1  ;;  %s2164_s1 = smov [#allocation3]  }
 0x228   : > { %p1951_p0 = pneg %p1950_p13  ;;  %s1952_s13 = sshll.u32 %s2164_s1, 4  ;;  %s1953_s13 = int_to_ptr.vmem [resolvable:$false] %s1952_s13 }
 0x229   : > { %s1954_s24 = scalar_lea.vmem %s1953_s13, 512  ;;  %p1955_p1 = scmp.lt.s32.totalorder %s2580_s14, %s1953_s13 }
 0x22a   : > { %p1956_p2 = scmp.lt.s32.totalorder %s1954_s24, %s1948_s25 }
 0x22b   : > { %1141 = vrot.lane.b32.xlu0 %v962_v40, %s2160_s21  ;;  %1329 = vrot.lane.b32.xlu1 %v2385_v55, %s2889_s29 }
 0x22c   : > { %p1957_p3 = por %p1956_p2, %p1955_p1 }
 0x22e   : > { %p1958_p5 = pnand %p1957_p3, %p1951_p0 }
 0x230   : > { %1961 = shalt.err (!%p1958_p5)
}
 0x231   : > { %s1962_s12 = scalar_lea.hbm %s2586_s30, 256  ;;  %s1966_s1 = scalar_lea.hbm %s2872_s7, 512 }
 0x232   : > { %p1963_p6 = scmp.ne.s32.totalorder %s2586_s30, %s1962_s12  ;;  %p1967_p10 = scmp.lt.s32.totalorder %s2586_s30, %s2872_s7 }
 0x233   : > { %p1968_p11 = scmp.lt.s32.totalorder %s1966_s1, %s1962_s12 }
 0x234   : > { %p1964_p7 = pnand %p1963_p6, %p2271_p4 }
 0x235   : > { %p1969_p12 = por %p1968_p11, %p1967_p10 }
 0x236   : > { %p1965_p9 = pneg %p1964_p7 }
 0x238   : > { %p1970_p13 = pnand %p1969_p12, %p1965_p9 }
 0x23a   : > { %1973 = shalt.err (!%p1970_p13)
}
 0x23b   : > { %s2905_s13 = smov 4   ;;  %s2906_s25 = smov 64  }
 0x23c   : > { %1845 = dma.vmem_to_hbm [thread:$0]  (%p2271_p4), %s2580_s14, 256, %s2586_s30, %s1350_s15, %s2906_s25, %s2906_s25, %s2905_s13  }
 0x23d   : > { %s2907_s29 = smov 72   ;;  %s2908_s0 = smov 40  }
 0x23e   : > { %1299 = vrot.lane.b32.xlu0 %v962_v40, %s2907_s29  ;;  %s572_s2 = scalar_lea.vmem [#allocation5], %s2435_s26  ;;  %s2909_s12 = sadd.s32 4294967295, %s2136_s22  }
 0x23f   : > { %s1405_s24 = sshll.u32 %s572_s2, 4  ;;  %s2623_s21 = sand.u32 1, %s2909_s12   ;;  %s2627_s24 = int_to_ptr.vmem [resolvable:$true] %s1405_s24 }
 0x240   : > { %s1424_s30 = sshll.u32 %s2441_s28, 4  ;;  %s2910_s14 = sshll.u32 %s2430_s19, 5  ;;  %s2641_s30 = int_to_ptr.vmem [resolvable:$true] %s1424_s30 }
 0x241   : > { %s2631_s26 = scalar_lea.vmem [#allocation8], %s2910_s14  ;;  %s2639_s29 = scalar_lea.hbm %s2873_s8, %s2577_s23 }
 0x242   : > { %1331 = vrot.lane.b32.xlu0 %v2407_v0, %s2908_s0  ;;  %s2647_s19 = scalar_lea.hbm %s2874_s9, %s2577_s23  ;;  %s1974_s14 = scalar_lea.vmem %s2627_s24, 256 }
 0x243   : > { %p1975_p0 = scmp.ne.s32.totalorder %s2627_s24, %s1974_s14  ;;  %s2165_s15 = smov [#allocation5]  }
 0x244   : > { %s1978_s1 = sshll.u32 %s2165_s15, 4  ;;  %s1979_s1 = int_to_ptr.vmem [resolvable:$false] %s1978_s1 }
 0x245   : > { %p1976_p1 = pnand %p1975_p0, %p2271_p4  ;;  %s1980_s3 = scalar_lea.vmem %s1979_s1, 512 }
 0x246   : > { %p1981_p3 = scmp.lt.s32.totalorder %s2627_s24, %s1979_s1  ;;  %p1982_p5 = scmp.lt.s32.totalorder %s1980_s3, %s1974_s14 }
 0x247   : > { %p1977_p2 = pneg %p1976_p1 }
 0x248   : > { %p1983_p6 = por %p1982_p5, %p1981_p3 }
 0x24a   : > { %p1984_p7 = pnand %p1983_p6, %p1977_p2 }
 0x259   : > { %v1118_v42 = vpop.permute.xlu1 %1117  ;;  %v870_v55 = vpop.permute.xlu0 %869 }
 0x25a   : > { %1801 = vst.msk [vmem:[%s572_s2 + $0x4] sm:$0xf] %vm863_vm10, %v1118_v42  ;;  %872 = vst.msk [vmem:[%s572_s2] sm:$0xf] %vm863_vm10, %v870_v55 }
 0x25d   : > { %v1197_v41 = vpop.permute.xlu0 %1196  ;;  %v1128_v43 = vpop.permute.xlu1 %1127 }
 0x25e   : > { %1804 = vst.msk [vmem:[%s572_s2 + $0x8] sm:$0xf] %vm863_vm10, %v1197_v41 }
 0x25f   : > { %1151 = vst.msk [vmem:[%s2631_s26 + $0x1] sm:$0x1] %vm987_vm11, %v1128_v43 }
 0x261   : > { %v1276_v0 = vpop.permute.xlu0 %1275  ;;  %v1286_v44 = vpop.permute.xlu1 %1285 }
 0x262   : > { %1807 = vst.msk [vmem:[%s572_s2 + $0xc] sm:$0xf] %vm863_vm10, %v1276_v0 }
 0x263   : > { %1309 = vst.msk [vmem:[%s2631_s26 + $0x3] sm:$0x1] %vm987_vm11, %v1286_v44 }
 0x264   : > { %1987 = shalt.err (!%p1984_p7)
}
 0x265   : > { %s1988_s23 = scalar_lea.hbm %s2639_s29, 256  ;;  %s1992_s0 = scalar_lea.hbm %s2873_s8, 512 }
 0x266   : > { %p1989_p9 = scmp.ne.s32.totalorder %s2639_s29, %s1988_s23  ;;  %p1993_p12 = scmp.lt.s32.totalorder %s2639_s29, %s2873_s8 }
 0x267   : > { %p1994_p13 = scmp.lt.s32.totalorder %s1992_s0, %s1988_s23 }
 0x268   : > { %p1990_p10 = pnand %p1989_p9, %p2271_p4 }
 0x269   : > { %p1995_p0 = por %p1994_p13, %p1993_p12 }
 0x26a   : > { %p1991_p11 = pneg %p1990_p10 }
 0x26c   : > { %p1996_p1 = pnand %p1995_p0, %p1991_p11 }
 0x26e   : > { %1999 = shalt.err (!%p1996_p1)
}
 0x26f   : > { %s2911_s3 = scalar_lea.sflag [#allocation6], %s2623_s21  ;;  %s2000_s12 = scalar_lea.vmem %s2641_s30, 256 }
 0x270   : > { %1846 = dma.vmem_to_hbm [thread:$0]  (%p2271_p4), %s2627_s24, 256, %s2639_s29, %s2911_s3, %s2906_s25, %s2906_s25, %s2905_s13  }
 0x271   : > { %p2001_p2 = scmp.ne.s32.totalorder %s2641_s30, %s2000_s12  ;;  %s2166_s14 = smov [#allocation7]  }
 0x272   : > { %s2004_s1 = sshll.u32 %s2166_s14, 4  ;;  %s2005_s1 = int_to_ptr.vmem [resolvable:$false] %s2004_s1 }
 0x273   : > { %p2002_p3 = pnand %p2001_p2, %p2271_p4  ;;  %s2006_s23 = scalar_lea.vmem %s2005_s1, 512 }
 0x274   : > { %p2007_p6 = scmp.lt.s32.totalorder %s2641_s30, %s2005_s1  ;;  %p2008_p7 = scmp.lt.s32.totalorder %s2006_s23, %s2000_s12 }
 0x275   : > { %p2003_p5 = pneg %p2002_p3 }
 0x276   : > { %p2009_p9 = por %p2008_p7, %p2007_p6 }
 0x278   : > { %p2010_p10 = pnand %p2009_p9, %p2003_p5 }
 0x27a   : > { %2013 = shalt.err (!%p2010_p10)
}
 0x27b   : > { %s2014_s2 = scalar_lea.hbm %s2647_s19, 256  ;;  %s2018_s28 = scalar_lea.hbm %s2874_s9, 512 }
 0x27c   : > { %p2015_p11 = scmp.ne.s32.totalorder %s2647_s19, %s2014_s2  ;;  %p2019_p0 = scmp.lt.s32.totalorder %s2647_s19, %s2874_s9 }
 0x27d   : > { %p2020_p1 = scmp.lt.s32.totalorder %s2018_s28, %s2014_s2 }
 0x27e   : > { %p2016_p12 = pnand %p2015_p11, %p2271_p4 }
 0x27f   : > { %p2021_p2 = por %p2020_p1, %p2019_p0 }
 0x280   : > { %p2017_p13 = pneg %p2016_p12 }
 0x282   : > { %p2022_p3 = pnand %p2021_p2, %p2017_p13 }
 0x284   : > { %2025 = shalt.err (!%p2022_p3)
}
 0x285   : > { %1847 = dma.vmem_to_hbm [thread:$0]  (%p2271_p4), %s2641_s30, 256, %s2647_s19, %s2911_s3, %s2906_s25, %s2906_s25, %s2905_s13   ;;  %v964_v45 = vpop.permute.xlu0 %963  ;;  %v966_v46 = vpop.permute.xlu1 %965 }
 0x286   : > { %988 = vst.msk [vmem:[%s2631_s26] sm:$0x1] %vm987_vm11, %v964_v45  ;;  %989 = vst.msk [vmem:[%s2631_s26 + $0x4] sm:$0x1] %vm987_vm11, %v966_v46  ;;  %s1832_s30 = sshll.u32 %s2128_s20, 9  ;;  %s1443_s19 = sshll.u32 %s2631_s26, 4  ;;  %s2772_s19 = int_to_ptr.vmem [resolvable:$true] %s1443_s19 }
 0x287   : > { %s2770_s1 = scalar_lea.hbm %s2875_s10, %s1832_s30  ;;  %s1462_s23 = sshll.u32 %s2459_s16, 4  ;;  %s2812_s23 = int_to_ptr.vmem [resolvable:$true] %s1462_s23 }
 0x288   : > { %s1365_s2 = scalar_lea.sflag [#allocation9], %s2623_s21  ;;  %s2026_s24 = scalar_lea.vmem %s2772_s19, 512 }
 0x289   : > { %v1207_v47 = vpop.permute.xlu0 %1206  ;;  %v1132_v48 = vpop.permute.xlu1 %1131  ;;  %p2027_p5 = scmp.ne.s32.totalorder %s2772_s19, %s2026_s24  ;;  %s2167_s29 = smov [#allocation8]  }
 0x28a   : > { %1230 = vst.msk [vmem:[%s2631_s26 + $0x2] sm:$0x1] %vm987_vm11, %v1207_v47  ;;  %1153 = vst.msk [vmem:[%s2631_s26 + $0x9] sm:$0x1] %vm987_vm11, %v1132_v48  ;;  %s2030_s28 = sshll.u32 %s2167_s29, 4  ;;  %s2031_s28 = int_to_ptr.vmem [resolvable:$false] %s2030_s28 }
 0x28b   : > { %p2028_p6 = pnand %p2027_p5, %p2271_p4  ;;  %s2032_s0 = scalar_lea.vmem %s2031_s28, 1024 }
 0x28c   : > { %p2033_p9 = scmp.lt.s32.totalorder %s2772_s19, %s2031_s28  ;;  %p2034_p10 = scmp.lt.s32.totalorder %s2032_s0, %s2026_s24 }
 0x28d   : > { %v968_v49 = vpop.permute.xlu0 %967  ;;  %v1136_v50 = vpop.permute.xlu1 %1135  ;;  %p2029_p7 = pneg %p2028_p6 }
 0x28e   : > { %990 = vst.msk [vmem:[%s2631_s26 + $0x8] sm:$0x1] %vm987_vm11, %v968_v49  ;;  %1155 = vst.msk [vmem:[%s2631_s26 + $0x11] sm:$0x1] %vm987_vm11, %v1136_v50  ;;  %p2035_p11 = por %p2034_p10, %p2033_p9 }
 0x290   : > { %p2036_p12 = pnand %p2035_p11, %p2029_p7 }
 0x291   : > { %v972_v51 = vpop.permute.xlu0 %971  ;;  %v1209_v52 = vpop.permute.xlu1 %1208 }
 0x292   : > { %992 = vst.msk [vmem:[%s2631_s26 + $0x10] sm:$0x1] %vm987_vm11, %v972_v51  ;;  %1231 = vst.msk [vmem:[%s2631_s26 + $0x6] sm:$0x1] %vm987_vm11, %v1209_v52 }
 0x295   : > { %v1130_v53 = vpop.permute.xlu0 %1129  ;;  %v1290_v54 = vpop.permute.xlu1 %1289 }
 0x296   : > { %1152 = vst.msk [vmem:[%s2631_s26 + $0x5] sm:$0x1] %vm987_vm11, %v1130_v53  ;;  %1311 = vst.msk [vmem:[%s2631_s26 + $0xb] sm:$0x1] %vm987_vm11, %v1290_v54 }
 0x299   : > { %v1211_v56 = vpop.permute.xlu0 %1210  ;;  %v1294_v57 = vpop.permute.xlu1 %1293 }
 0x29a   : > { %1232 = vst.msk [vmem:[%s2631_s26 + $0xa] sm:$0x1] %vm987_vm11, %v1211_v56  ;;  %1313 = vst.msk [vmem:[%s2631_s26 + $0x13] sm:$0x1] %vm987_vm11, %v1294_v57 }
 0x29d   : > { %v1215_v58 = vpop.permute.xlu0 %1214  ;;  %v970_v59 = vpop.permute.xlu1 %969 }
 0x29e   : > { %1234 = vst.msk [vmem:[%s2631_s26 + $0x12] sm:$0x1] %vm987_vm11, %v1215_v58  ;;  %991 = vst.msk [vmem:[%s2631_s26 + $0xc] sm:$0x1] %vm987_vm11, %v970_v59 }
 0x2a1   : > { %v1288_v60 = vpop.permute.xlu0 %1287  ;;  %v974_v61 = vpop.permute.xlu1 %973 }
 0x2a2   : > { %1310 = vst.msk [vmem:[%s2631_s26 + $0x7] sm:$0x1] %vm987_vm11, %v1288_v60  ;;  %993 = vst.msk [vmem:[%s2631_s26 + $0x14] sm:$0x1] %vm987_vm11, %v974_v61 }
 0x2a5   : > { %v976_v62 = vpop.permute.xlu0 %975  ;;  %v1140_v63 = vpop.permute.xlu1 %1139 }
 0x2a6   : > { %994 = vst.msk [vmem:[%s2631_s26 + $0x18] sm:$0x1] %vm987_vm11, %v976_v62  ;;  %1157 = vst.msk [vmem:[%s2631_s26 + $0x19] sm:$0x1] %vm987_vm11, %v1140_v63 }
 0x2a9   : > { %v1134_v1 = vpop.permute.xlu0 %1133  ;;  %v1213_v2 = vpop.permute.xlu1 %1212 }
 0x2aa   : > { %1154 = vst.msk [vmem:[%s2631_s26 + $0xd] sm:$0x1] %vm987_vm11, %v1134_v1  ;;  %1233 = vst.msk [vmem:[%s2631_s26 + $0xe] sm:$0x1] %vm987_vm11, %v1213_v2 }
 0x2ad   : > { %v1138_v3 = vpop.permute.xlu0 %1137  ;;  %v1217_v4 = vpop.permute.xlu1 %1216 }
 0x2ae   : > { %1156 = vst.msk [vmem:[%s2631_s26 + $0x15] sm:$0x1] %vm987_vm11, %v1138_v3  ;;  %1235 = vst.msk [vmem:[%s2631_s26 + $0x16] sm:$0x1] %vm987_vm11, %v1217_v4 }
 0x2b1   : > { %v1219_v5 = vpop.permute.xlu0 %1218  ;;  %v1298_v6 = vpop.permute.xlu1 %1297 }
 0x2b2   : > { %1236 = vst.msk [vmem:[%s2631_s26 + $0x1a] sm:$0x1] %vm987_vm11, %v1219_v5  ;;  %1315 = vst.msk [vmem:[%s2631_s26 + $0x1b] sm:$0x1] %vm987_vm11, %v1298_v6 }
 0x2b5   : > { %v1292_v7 = vpop.permute.xlu0 %1291  ;;  %v978_v8 = vpop.permute.xlu1 %977 }
 0x2b6   : > { %1312 = vst.msk [vmem:[%s2631_s26 + $0xf] sm:$0x1] %vm987_vm11, %v1292_v7  ;;  %995 = vst.msk [vmem:[%s2631_s26 + $0x1c] sm:$0x1] %vm987_vm11, %v978_v8 }
 0x2b9   : > { %v1296_v9 = vpop.permute.xlu0 %1295  ;;  %v1221_v10 = vpop.permute.xlu1 %1220 }
 0x2ba   : > { %1314 = vst.msk [vmem:[%s2631_s26 + $0x17] sm:$0x1] %vm987_vm11, %v1296_v9  ;;  %1237 = vst.msk [vmem:[%s2631_s26 + $0x1e] sm:$0x1] %vm987_vm11, %v1221_v10 }
 0x2bd   : > { %v1142_v11 = vpop.permute.xlu0 %1141  ;;  %v1330_v12 = vpop.permute.xlu1 %1329 }
 0x2be   : > { %1158 = vst.msk [vmem:[%s2631_s26 + $0x1d] sm:$0x1] %vm987_vm11, %v1142_v11  ;;  %1347 = vst.msk [vmem:[%s2459_s16 + $0x1b] sm:$0x1] %vm987_vm11, %v1330_v12 }
 0x2c1   : > { %v1300_v13 = vpop.permute.xlu0 %1299 }
 0x2c2   : > { %1316 = vst.msk [vmem:[%s2631_s26 + $0x1f] sm:$0x1] %vm987_vm11, %v1300_v13 }
 0x2c3   : > { %2039 = shalt.err (!%p2036_p12)
}
 0x2c4   : > { %s2040_s26 = scalar_lea.hbm %s2770_s1, 512  ;;  %s2044_s12 = scalar_lea.hbm %s2875_s10, 1024 }
 0x2c5   : > { %p2041_p13 = scmp.ne.s32.totalorder %s2770_s1, %s2040_s26  ;;  %p2045_p2 = scmp.lt.s32.totalorder %s2770_s1, %s2875_s10 }
 0x2c6   : > { %p2046_p3 = scmp.lt.s32.totalorder %s2044_s12, %s2040_s26 }
 0x2c7   : > { %p2042_p0 = pnand %p2041_p13, %p2271_p4 }
 0x2c8   : > { %p2047_p5 = por %p2046_p3, %p2045_p2 }
 0x2c9   : > { %p2043_p1 = pneg %p2042_p0 }
 0x2cb   : > { %p2048_p6 = pnand %p2047_p5, %p2043_p1 }
 0x2cd   : > { %2051 = shalt.err (!%p2048_p6)
}
 0x2ce   : > { %1848 = dma.vmem_to_hbm [thread:$0]  (%p2271_p4), %s2772_s19, 512, %s2770_s1, %s1365_s2, %s2906_s25, %s2906_s25, %s2905_s13   ;;  %v1332_v14 = vpop.permute.xlu0 %1331 }
 0x2cf   : > { %s2808_s0 = scalar_lea.hbm %s2876_s11, %s1832_s30  ;;  %1348 = vst.msk [vmem:[%s2459_s16 + $0x1f] sm:$0x1] %vm987_vm11, %v1332_v14  ;;  %s2052_s26 = scalar_lea.vmem %s2812_s23, 512 }
 0x2d0   : > { %p2053_p7 = scmp.ne.s32.totalorder %s2812_s23, %s2052_s26  ;;  %s2168_s20 = smov [#allocation10]  }
 0x2d1   : > { %s2056_s19 = sshll.u32 %s2168_s20, 4  ;;  %s2057_s19 = int_to_ptr.vmem [resolvable:$false] %s2056_s19 }
 0x2d2   : > { %p2054_p9 = pnand %p2053_p7, %p2271_p4  ;;  %s2058_s1 = scalar_lea.vmem %s2057_s19, 1024 }
 0x2d3   : > { %p2059_p11 = scmp.lt.s32.totalorder %s2812_s23, %s2057_s19  ;;  %p2060_p12 = scmp.lt.s32.totalorder %s2058_s1, %s2052_s26 }
 0x2d4   : > { %p2055_p10 = pneg %p2054_p9 }
 0x2d5   : > { %p2061_p13 = por %p2060_p12, %p2059_p11 }
 0x2d7   : > { %p2062_p0 = pnand %p2061_p13, %p2055_p10 }
 0x2d9   : > { %2065 = shalt.err (!%p2062_p0)
}
 0x2da   : > { %s2066_s30 = scalar_lea.hbm %s2808_s0, 512  ;;  %s2070_s3 = scalar_lea.hbm %s2876_s11, 1024 }
 0x2db   : > { %p2067_p1 = scmp.ne.s32.totalorder %s2808_s0, %s2066_s30  ;;  %p2071_p5 = scmp.lt.s32.totalorder %s2808_s0, %s2876_s11 }
 0x2dc   : > { %p2072_p6 = scmp.lt.s32.totalorder %s2070_s3, %s2066_s30 }
 0x2dd   : > { %p2068_p2 = pnand %p2067_p1, %p2271_p4 }
 0x2de   : > { %p2073_p7 = por %p2072_p6, %p2071_p5 }
 0x2df   : > { %p2069_p3 = pneg %p2068_p2 }
 0x2e1   : > { %p2074_p9 = pnand %p2073_p7, %p2069_p3 }
 0x2e3   : > { %2077 = shalt.err (!%p2074_p9)
}
 0x2e4   : > { %1849 = dma.vmem_to_hbm [thread:$0]  (%p2271_p4), %s2812_s23, 512, %s2808_s0, %s1365_s2, %s2906_s25, %s2906_s25, %s2905_s13  }
 0x2e5 PF: > { %p1871_p10 = scmp.ge.s32.totalorder %s2136_s22, 2  ;;  %s1477_s24 = sand.u32 1, %s2116_s17  }
 0x2e6   : > { %s1478_s28 = scalar_lea.sflag [#allocation4], %s1477_s24 }
 0x2e7   : > { %p1856_p11 = pnand %p1871_p10, %p2280_p8 }
 0x2e9   : > { %p1857_p12 = pneg %p1856_p11 }
 0x2eb   : > { %2103 = dma.done.wait (%p1857_p12), %s1478_s28, 256  }
 0x2ec   : > { %2105 = vsyncadd (%p1857_p12), %s1478_s28, 4294967040  ;;  %s2913_s27 = sadd.s32 4294967294, %s2136_s22  }
 0x2ed   : > { %s1486_s26 = sand.u32 1, %s2913_s27  }
 0x2ee   : > { %s1487_s20 = scalar_lea.sflag [#allocation6], %s1486_s26 }
 0x2ef   : > { %2107 = dma.done.wait (%p1857_p12), %s1487_s20, 512  }
 0x2f0   : > { %2109 = vsyncadd (%p1857_p12), %s1487_s20, 4294966784  ;;  %s1505_s21 = scalar_lea.sflag [#allocation9], %s1486_s26 }
 0x2f1   : > { %2111 = dma.done.wait (%p1857_p12), %s1505_s21, 1024  }
 0x2f2   : > { %2113 = vsyncadd (%p1857_p12), %s1505_s21, 4294966272  ;;  %s31_s22 = sadd.s32 1, %s2136_s22   ;;  %s2914_s13 = sld [smem:[#allocation14_spill]] }
 0x2f3   : > { %p28_p4 = scmp.ge.s32.totalorder %s31_s22, 4   ;;  %s2915_s19 = sld [smem:[#allocation18_spill]] }
 0x2f4   : > { %s2916_s20 = sld [smem:[#allocation15_spill]]  ;;  %s2918_s17 = smov %s2120_s18 }
 0x2f5   : > { %s2917_s21 = sld [smem:[#allocation16_spill]]  ;;  %30 = sbr.rel (!%p28_p4) target bundleno = 13 (0xd), region = 182 }
 0x2f8   : > { %s2919_s18 = smov %s2914_s13 }
 0x2fa   :  { %1519 = vsyncpa [#allocation4], 1 }
 0x2fb   :  { %1521 = vsyncpa [#allocation4 + $0x1], 1 }
 0x2fc   :  { %1522 = vsyncpa [#allocation6], 1 }
 0x2fd   :  { %1524 = vsyncpa [#allocation6 + $0x1], 1 }
 0x2fe   :  { %1525 = vsyncpa [#allocation9], 1 }
 0x2ff   :  { %1527 = vsyncpa [#allocation9 + $0x1], 1 }

</bundles_post_ra>
